<compile_context>
chip_gen: v5e
topology: v5e:2x2
jax: 0.10.0
libtpu: 0.0.40
codegen_flags: <defaults>
</compile_context>

<pallas_src>
import functools

import jax
import jax.numpy as jnp
from jax.experimental import pallas as pl
from jax.experimental.pallas import tpu as pltpu


# ----------------------------------------------------------------------------
# Kernel 1: fused struc/cites encoders + 'add' fusion + mlp + Fc predictor.
# One grid step per row tile of the flattened (T*N, N) adjacency slab.
# ----------------------------------------------------------------------------
def _fused_enc_kernel(adj_ref, gt_ref, w1_ref, b1_ref, w2_ref, b2_ref,
                      mw_ref, mb_ref, pw_ref, pb_ref,
                      fused_ref, sqerr_ref):
    d2 = w2_ref.shape[1] // 2
    adj = adj_ref[...]                                           # (tile, N) f32

    # Layer 1: struc|cites weights concatenated along lanes -> (tile, 2*d1).
    h1 = jnp.dot(adj.astype(jnp.bfloat16), w1_ref[...],
                 preferred_element_type=jnp.float32) + b1_ref[...]
    h1 = jnp.maximum(h1, 0.0)          # nn.Dropout is identity at inference

    # Layer 2: block-diagonal weights keep the two encoders independent.
    h2 = jnp.dot(h1.astype(jnp.bfloat16), w2_ref[...],
                 preferred_element_type=jnp.float32) + b2_ref[...]
    h2 = jnp.maximum(h2, 0.0)                                    # (tile, 2*d2)

    edge_h = h2[:, :d2]                                          # struc output
    node_h = h2[:, d2:]                                          # cites output

    # fusion_mode == 'add' (detach is a no-op in forward) + mlp Linear.
    fused_ref[...] = (
        jnp.dot((edge_h + node_h).astype(jnp.bfloat16), mw_ref[...],
                preferred_element_type=jnp.float32) + mb_ref[...]
    )

    # Fc node predictor + per-row squared error against precomputed target.
    pred = jnp.dot(node_h, pw_ref[...],
                   preferred_element_type=jnp.float32) + pb_ref[...]
    sqerr_ref[...] = jnp.square(pred - gt_ref[...])


def _pick_row_tile(m_rows):
    """>=2 row tiles (so both v7x TensorCores get work) when sublane-aligned."""
    half = m_rows // 2
    if m_rows % 2 == 0 and half % 8 == 0:
        return half
    return m_rows


def fused_encoder(adj_stack, params):
    T, N, _ = adj_stack.shape
    d1 = params["sw1"].shape[1]
    d2 = params["sw2"].shape[1]
    M = T * N
    adj_flat = adj_stack.reshape(M, N)

    # Citation ground-truth proxy (see TODO below): log1p per-node column degree.
    gt = jnp.log1p(jnp.sum(adj_stack, axis=1)).reshape(M, 1)

    # Concatenated layer-1 weights (lane-dense) and block-diagonal layer-2.
    w1c = jnp.concatenate([params["sw1"], params["cw1"]], axis=1)      # (N, 2*d1)
    b1c = jnp.concatenate([params["sb1"], params["cb1"]], axis=1)      # (1, 2*d1)
    z = jnp.zeros((d1, d2), jnp.float32)
    w2c = jnp.concatenate(
        [jnp.concatenate([params["sw2"], z], axis=1),
         jnp.concatenate([z, params["cw2"]], axis=1)], axis=0)         # (2*d1, 2*d2)
    b2c = jnp.concatenate([params["sb2"], params["cb2"]], axis=1)      # (1, 2*d2)

    # bf16 MXU operands (f32 accumulation happens inside the kernel).
    w1c = w1c.astype(jnp.bfloat16)
    w2c = w2c.astype(jnp.bfloat16)
    mlp_w = params["mlp_w"].astype(jnp.bfloat16)

    tile_rows = _pick_row_tile(M)
    grid = (M // tile_rows,)

    fused, sqerr = pl.pallas_call(
        _fused_enc_kernel,
        out_shape=(jax.ShapeDtypeStruct((M, d2), jnp.float32),
                   jax.ShapeDtypeStruct((M, 1), jnp.float32)),
        grid=grid,
        in_specs=[
            pl.BlockSpec((tile_rows, N), lambda i: (i, 0)),
            pl.BlockSpec((tile_rows, 1), lambda i: (i, 0)),
            pl.BlockSpec((N, 2 * d1), lambda i: (0, 0)),
            pl.BlockSpec((1, 2 * d1), lambda i: (0, 0)),
            pl.BlockSpec((2 * d1, 2 * d2), lambda i: (0, 0)),
            pl.BlockSpec((1, 2 * d2), lambda i: (0, 0)),
            pl.BlockSpec((d2, d2), lambda i: (0, 0)),
            pl.BlockSpec((1, d2), lambda i: (0, 0)),
            pl.BlockSpec((d2, 1), lambda i: (0, 0)),
            pl.BlockSpec((1, 1), lambda i: (0, 0)),
        ],
        out_specs=(pl.BlockSpec((tile_rows, d2), lambda i: (i, 0)),
                   pl.BlockSpec((tile_rows, 1), lambda i: (i, 0))),
        compiler_params=pltpu.CompilerParams(
            dimension_semantics=("parallel",)),
    )(adj_flat, gt, w1c, b1c, w2c, b2c,
      mlp_w, params["mlp_b"], params["pred_w"], params["pred_b"])
    return fused, sqerr


# ----------------------------------------------------------------------------
# Kernel 2: one LSTM layer. x@W_ih precomputed as a single matmul, recurrence
# kept on-chip inside one grid step; hidden/cell state never leave VMEM/vregs.
# ----------------------------------------------------------------------------
def _lstm_kernel(x_ref, wih_ref, whh_ref, b_ref, out_ref, gx_ref, *, n_nodes):
    M = x_ref.shape[0]
    H = whh_ref.shape[0]
    n_steps = M // n_nodes

    # (1) input->hidden contribution for every timestep in one MXU matmul.
    gx_ref[...] = (jnp.dot(x_ref[...], wih_ref[...],
                           preferred_element_type=jnp.float32) + b_ref[...])
    whh = whh_ref[...]

    # (2) sequential recurrence: only (N,H)@(H,4H) + EUP gate math per step.
    def step(t, carry):
        h, c = carry
        rows = pl.ds(t * n_nodes, n_nodes)
        gates = gx_ref[rows, :] + jnp.dot(h, whh,
                                          preferred_element_type=jnp.float32)
        i_g = jax.nn.sigmoid(gates[:, 0 * H:1 * H])
        f_g = jax.nn.sigmoid(gates[:, 1 * H:2 * H])
        g_g = jnp.tanh(gates[:, 2 * H:3 * H])
        o_g = jax.nn.sigmoid(gates[:, 3 * H:4 * H])
        c_new = f_g * c + i_g * g_g
        h_new = o_g * jnp.tanh(c_new)
        out_ref[rows, :] = h_new
        return h_new, c_new

    zeros = jnp.zeros((n_nodes, H), jnp.float32)
    jax.lax.fori_loop(0, n_steps, step, (zeros, zeros), unroll=True)


def lstm_layer(x, wih, whh, b, n_nodes):
    M, Hin = x.shape
    H = whh.shape[0]
    kernel = functools.partial(_lstm_kernel, n_nodes=n_nodes)
    return pl.pallas_call(
        kernel,
        out_shape=jax.ShapeDtypeStruct((M, H), jnp.float32),
        grid=(1,),
        in_specs=[
            pl.BlockSpec((M, Hin), lambda i: (0, 0)),
            pl.BlockSpec((Hin, 4 * H), lambda i: (0, 0)),
            pl.BlockSpec((H, 4 * H), lambda i: (0, 0)),
            pl.BlockSpec((1, 4 * H), lambda i: (0, 0)),
        ],
        out_specs=pl.BlockSpec((M, H), lambda i: (0, 0)),
        scratch_shapes=[pltpu.VMEM((M, 4 * H), jnp.float32)],
        compiler_params=pltpu.CompilerParams(
            dimension_semantics=("arbitrary",)),
    )(x, wih, whh, b)


# ----------------------------------------------------------------------------
# Full forward pass (tiny glue in plain JAX, hot paths fused into 2 kernels).
# ----------------------------------------------------------------------------
def dyngraph2vec_forward(adj_stack, params):
    T, N, _ = adj_stack.shape

    # fused: mlp(struc_h + cites_h) for all T*N rows; sqerr: per-row node loss.
    fused, sqerr = fused_encoder(adj_stack, params)        # (T*N, H), (T*N, 1)

    # calc_cites: per-timestep mean over nodes of summed sq. error, / win_size
    # == global mean over all T*N rows (pred_year = 1).
    # TODO(synk): cites_loader.build_cites / FcPredictor internals are external
    # and unavailable; predictor approximated as Linear(H, 1) and ground truth
    # approximated by log1p of per-node citation (column) degree.
    node_loss = jnp.mean(sqerr)

    # Temporal encoder: stack of LSTMs; dyn_emb = last timestep of last layer.
    temp = fused                                           # rows = [t0 | t1 | ...]
    for (wih, whh, bl) in params["lstm"]:
        temp = lstm_layer(temp, wih, whh, bl, N)
    dyn_emb = temp[(T - 1) * N:, :]                        # (N, temp_dims[-1])
    return dyn_emb, node_loss


# ----------------------------------------------------------------------------
# Deterministic parameter init (PyTorch-style uniform(-1/sqrt(fan_in), +...)).
# Weights stored as (in_features, out_features) so y = x @ W + b.
# ----------------------------------------------------------------------------
def _init_linear(key, fan_in, fan_out):
    kw, kb = jax.random.split(key)
    bound = 1.0 / jnp.sqrt(jnp.float32(fan_in))
    w = jax.random.uniform(kw, (fan_in, fan_out), jnp.float32, -bound, bound)
    b = jax.random.uniform(kb, (1, fan_out), jnp.float32, -bound, bound)
    return w, b


def _init_lstm(key, h_in, h_out):
    k1, k2, k3, k4 = jax.random.split(key, 4)
    bound = 1.0 / jnp.sqrt(jnp.float32(h_out))
    wih = jax.random.uniform(k1, (h_in, 4 * h_out), jnp.float32, -bound, bound)
    whh = jax.random.uniform(k2, (h_out, 4 * h_out), jnp.float32, -bound, bound)
    b_ih = jax.random.uniform(k3, (1, 4 * h_out), jnp.float32, -bound, bound)
    b_hh = jax.random.uniform(k4, (1, 4 * h_out), jnp.float32, -bound, bound)
    return wih, whh, b_ih + b_hh


if __name__ == "__main__":
    # Small module-consistent shapes:
    #   num_nodes N = 32, window T = 4
    #   struc_dims = [N, 64, 32]  (2 struc layers, hidden_channels = 32)
    #   temp_dims  = [32, 16]     (1 LSTM layer)
    N, T = 32, 4
    struc_dims = [N, 64, 32]
    temp_dims = [32, 16]
    H = struc_dims[-1]

    key = jax.random.PRNGKey(0)
    keys = jax.random.split(key, 8)

    # Dense historical adjacency matrices (synthetic, deterministic, 0/1).
    adj_stack = (jax.random.uniform(keys[0], (T, N, N)) < 0.2).astype(jnp.float32)

    sw1, sb1 = _init_linear(keys[1], struc_dims[0], struc_dims[1])
    sw2, sb2 = _init_linear(keys[2], struc_dims[1], struc_dims[2])
    cw1, cb1 = _init_linear(keys[3], struc_dims[0], struc_dims[1])
    cw2, cb2 = _init_linear(keys[4], struc_dims[1], struc_dims[2])
    mlp_w, mlp_b = _init_linear(keys[5], H, H)           # fusion_mode == 'add'
    pred_w, pred_b = _init_linear(keys[6], H, 1)         # FcPredictor(H, node_year=1)
    lstm_params = [_init_lstm(keys[7], temp_dims[0], temp_dims[1])]

    params = dict(
        sw1=sw1, sb1=sb1, sw2=sw2, sb2=sb2,
        cw1=cw1, cb1=cb1, cw2=cw2, cb2=cb2,
        mlp_w=mlp_w, mlp_b=mlp_b,
        pred_w=pred_w, pred_b=pred_b,
        lstm=lstm_params,
    )

    fwd = jax.jit(dyngraph2vec_forward)
    dyn_emb, node_loss = fwd(adj_stack, params)
    jax.block_until_ready((dyn_emb, node_loss))

    assert dyn_emb.shape == (N, temp_dims[-1])
    assert node_loss.shape == ()
    print("KERNEL_OK")
</pallas_src>

<mosaic_0001>
module attributes {stable_mosaic.version = 11 : i64} {
  func.func @_fused_enc_kernel(%arg0: i32, %arg1: memref<64x32xf32, #tpu.memory_space<vmem>>, %arg2: memref<64x1xf32, #tpu.memory_space<vmem>>, %arg3: memref<32x128xbf16, #tpu.memory_space<vmem>>, %arg4: memref<1x128xf32, #tpu.memory_space<vmem>>, %arg5: memref<128x64xbf16, #tpu.memory_space<vmem>>, %arg6: memref<1x64xf32, #tpu.memory_space<vmem>>, %arg7: memref<32x32xbf16, #tpu.memory_space<vmem>>, %arg8: memref<1x32xf32, #tpu.memory_space<vmem>>, %arg9: memref<32x1xf32, #tpu.memory_space<vmem>>, %arg10: memref<1x1xf32, #tpu.memory_space<vmem>>, %arg11: memref<64x32xf32, #tpu.memory_space<vmem>>, %arg12: memref<64x1xf32, #tpu.memory_space<vmem>>) attributes {dimension_semantics = [#tpu.dimension_semantics<parallel>], iteration_bounds = array<i64: 2>, scalar_prefetch = 0 : i64, scratch_operands = 0 : i64, tpu.core_type = #tpu.core_type<tc>, window_params = [{transform_indices = @transform_0, window_bounds = array<i64: 64, 32>}, {transform_indices = @transform_1, window_bounds = array<i64: 64, 1>}, {pipeline_mode = #tpu.pipeline_mode<synchronous>, transform_indices = @transform_2, window_bounds = array<i64: 32, 128>}, {pipeline_mode = #tpu.pipeline_mode<synchronous>, transform_indices = @transform_3, window_bounds = array<i64: 1, 128>}, {pipeline_mode = #tpu.pipeline_mode<synchronous>, transform_indices = @transform_4, window_bounds = array<i64: 128, 64>}, {pipeline_mode = #tpu.pipeline_mode<synchronous>, transform_indices = @transform_5, window_bounds = array<i64: 1, 64>}, {pipeline_mode = #tpu.pipeline_mode<synchronous>, transform_indices = @transform_6, window_bounds = array<i64: 32, 32>}, {pipeline_mode = #tpu.pipeline_mode<synchronous>, transform_indices = @transform_7, window_bounds = array<i64: 1, 32>}, {pipeline_mode = #tpu.pipeline_mode<synchronous>, transform_indices = @transform_8, window_bounds = array<i64: 32, 1>}, {pipeline_mode = #tpu.pipeline_mode<synchronous>, transform_indices = @transform_9, window_bounds = array<i64: 1, 1>}, {transform_indices = @transform_10, window_bounds = array<i64: 64, 32>}, {transform_indices = @transform_11, window_bounds = array<i64: 64, 1>}]} {
    %c0 = arith.constant 0 : index
    %c0_0 = arith.constant 0 : index
    %0 = vector.load %arg1[%c0, %c0_0] : memref<64x32xf32, #tpu.memory_space<vmem>>, vector<64x32xf32>
    %1 = arith.truncf %0 : vector<64x32xf32> to vector<64x32xbf16>
    %c0_1 = arith.constant 0 : index
    %c0_2 = arith.constant 0 : index
    %2 = vector.load %arg3[%c0_1, %c0_2] : memref<32x128xbf16, #tpu.memory_space<vmem>>, vector<32x128xbf16>
    %cst = arith.constant dense<0.000000e+00> : vector<64x128xf32>
    %3 = tpu.matmul %1, %2, %cst {dimension_numbers = #tpu.dot_dimension_numbers<[1], [0], [0], [1], [0, 0, 1, 1], [], []>} : vector<64x32xbf16>, vector<32x128xbf16>, vector<64x128xf32> -> vector<64x128xf32>
    %c0_3 = arith.constant 0 : index
    %c0_4 = arith.constant 0 : index
    %4 = vector.load %arg4[%c0_3, %c0_4] : memref<1x128xf32, #tpu.memory_space<vmem>>, vector<1x128xf32>
    %5 = vector.broadcast %4 : vector<1x128xf32> to vector<64x128xf32>
    %6 = arith.addf %3, %5 : vector<64x128xf32>
    %cst_5 = arith.constant 0.000000e+00 : f32
    %7 = vector.broadcast %cst_5 : f32 to vector<64x128xf32>
    %8 = arith.maximumf %6, %7 : vector<64x128xf32>
    %9 = arith.truncf %8 : vector<64x128xf32> to vector<64x128xbf16>
    %c0_6 = arith.constant 0 : index
    %c0_7 = arith.constant 0 : index
    %10 = vector.load %arg5[%c0_6, %c0_7] : memref<128x64xbf16, #tpu.memory_space<vmem>>, vector<128x64xbf16>
    %cst_8 = arith.constant dense<0.000000e+00> : vector<64x64xf32>
    %11 = tpu.matmul %9, %10, %cst_8 {dimension_numbers = #tpu.dot_dimension_numbers<[1], [0], [0], [1], [0, 0, 1, 1], [], []>} : vector<64x128xbf16>, vector<128x64xbf16>, vector<64x64xf32> -> vector<64x64xf32>
    %c0_9 = arith.constant 0 : index
    %c0_10 = arith.constant 0 : index
    %12 = vector.load %arg6[%c0_9, %c0_10] : memref<1x64xf32, #tpu.memory_space<vmem>>, vector<1x64xf32>
    %13 = vector.broadcast %12 : vector<1x64xf32> to vector<64x64xf32>
    %14 = arith.addf %11, %13 : vector<64x64xf32>
    %cst_11 = arith.constant 0.000000e+00 : f32
    %15 = vector.broadcast %cst_11 : f32 to vector<64x64xf32>
    %16 = arith.maximumf %14, %15 : vector<64x64xf32>
    %17 = vector.extract_strided_slice %16 {offsets = [0, 0], sizes = [64, 32], strides = [1, 1]} : vector<64x64xf32> to vector<64x32xf32>
    %18 = vector.extract_strided_slice %16 {offsets = [0, 32], sizes = [64, 32], strides = [1, 1]} : vector<64x64xf32> to vector<64x32xf32>
    %19 = arith.addf %17, %18 : vector<64x32xf32>
    %20 = arith.truncf %19 : vector<64x32xf32> to vector<64x32xbf16>
    %c0_12 = arith.constant 0 : index
    %c0_13 = arith.constant 0 : index
    %21 = vector.load %arg7[%c0_12, %c0_13] : memref<32x32xbf16, #tpu.memory_space<vmem>>, vector<32x32xbf16>
    %cst_14 = arith.constant dense<0.000000e+00> : vector<64x32xf32>
    %22 = tpu.matmul %20, %21, %cst_14 {dimension_numbers = #tpu.dot_dimension_numbers<[1], [0], [0], [1], [0, 0, 1, 1], [], []>} : vector<64x32xbf16>, vector<32x32xbf16>, vector<64x32xf32> -> vector<64x32xf32>
    %c0_15 = arith.constant 0 : index
    %c0_16 = arith.constant 0 : index
    %23 = vector.load %arg8[%c0_15, %c0_16] : memref<1x32xf32, #tpu.memory_space<vmem>>, vector<1x32xf32>
    %24 = vector.broadcast %23 : vector<1x32xf32> to vector<64x32xf32>
    %25 = arith.addf %22, %24 : vector<64x32xf32>
    %c0_17 = arith.constant 0 : index
    %c0_18 = arith.constant 0 : index
    %26 = vector.load %arg11[%c0_17, %c0_18] : memref<64x32xf32, #tpu.memory_space<vmem>>, vector<64x32xf32>
    tpu.vector_store %arg11[%c0_17, %c0_18], %25 {strides = array<i32>} : memref<64x32xf32, #tpu.memory_space<vmem>>, vector<64x32xf32>,
    %c0_19 = arith.constant 0 : index
    %c0_20 = arith.constant 0 : index
    %27 = vector.load %arg9[%c0_19, %c0_20] : memref<32x1xf32, #tpu.memory_space<vmem>>, vector<32x1xf32>
    %cst_21 = arith.constant dense<0.000000e+00> : vector<64x1xf32>
    %28 = tpu.matmul %18, %27, %cst_21 {dimension_numbers = #tpu.dot_dimension_numbers<[1], [0], [0], [1], [0, 0, 1, 1], [], []>} : vector<64x32xf32>, vector<32x1xf32>, vector<64x1xf32> -> vector<64x1xf32>
    %c0_22 = arith.constant 0 : index
    %c0_23 = arith.constant 0 : index
    %29 = vector.load %arg10[%c0_22, %c0_23] : memref<1x1xf32, #tpu.memory_space<vmem>>, vector<1x1xf32>
    %30 = vector.broadcast %29 : vector<1x1xf32> to vector<64x1xf32>
    %31 = arith.addf %28, %30 : vector<64x1xf32>
    %c0_24 = arith.constant 0 : index
    %c0_25 = arith.constant 0 : index
    %32 = vector.load %arg2[%c0_24, %c0_25] : memref<64x1xf32, #tpu.memory_space<vmem>>, vector<64x1xf32>
    %33 = arith.subf %31, %32 : vector<64x1xf32>
    %34 = arith.mulf %33, %33 : vector<64x1xf32>
    %c0_26 = arith.constant 0 : index
    %c0_27 = arith.constant 0 : index
    %35 = vector.load %arg12[%c0_26, %c0_27] : memref<64x1xf32, #tpu.memory_space<vmem>>, vector<64x1xf32>
    tpu.vector_store %arg12[%c0_26, %c0_27], %34 {strides = array<i32>} : memref<64x1xf32, #tpu.memory_space<vmem>>, vector<64x1xf32>,
    return
  }
  func.func @transform_0(%arg0: i32) -> (i32, i32) {
    %c0_i32 = arith.constant 0 : i32
    %c0_i32_0 = arith.constant 0 : i32
    return %arg0, %c0_i32 : i32, i32
  }
  func.func @transform_1(%arg0: i32) -> (i32, i32) {
    %c0_i32 = arith.constant 0 : i32
    %c0_i32_0 = arith.constant 0 : i32
    return %arg0, %c0_i32 : i32, i32
  }
  func.func @transform_2(%arg0: i32) -> (i32, i32) {
    %c0_i32 = arith.constant 0 : i32
    %c0_i32_0 = arith.constant 0 : i32
    %c0_i32_1 = arith.constant 0 : i32
    return %c0_i32, %c0_i32_0 : i32, i32
  }
  func.func @transform_3(%arg0: i32) -> (i32, i32) {
    %c0_i32 = arith.constant 0 : i32
    %c0_i32_0 = arith.constant 0 : i32
    %c0_i32_1 = arith.constant 0 : i32
    return %c0_i32, %c0_i32_0 : i32, i32
  }
  func.func @transform_4(%arg0: i32) -> (i32, i32) {
    %c0_i32 = arith.constant 0 : i32
    %c0_i32_0 = arith.constant 0 : i32
    %c0_i32_1 = arith.constant 0 : i32
    return %c0_i32, %c0_i32_0 : i32, i32
  }
  func.func @transform_5(%arg0: i32) -> (i32, i32) {
    %c0_i32 = arith.constant 0 : i32
    %c0_i32_0 = arith.constant 0 : i32
    %c0_i32_1 = arith.constant 0 : i32
    return %c0_i32, %c0_i32_0 : i32, i32
  }
  func.func @transform_6(%arg0: i32) -> (i32, i32) {
    %c0_i32 = arith.constant 0 : i32
    %c0_i32_0 = arith.constant 0 : i32
    %c0_i32_1 = arith.constant 0 : i32
    return %c0_i32, %c0_i32_0 : i32, i32
  }
  func.func @transform_7(%arg0: i32) -> (i32, i32) {
    %c0_i32 = arith.constant 0 : i32
    %c0_i32_0 = arith.constant 0 : i32
    %c0_i32_1 = arith.constant 0 : i32
    return %c0_i32, %c0_i32_0 : i32, i32
  }
  func.func @transform_8(%arg0: i32) -> (i32, i32) {
    %c0_i32 = arith.constant 0 : i32
    %c0_i32_0 = arith.constant 0 : i32
    %c0_i32_1 = arith.constant 0 : i32
    return %c0_i32, %c0_i32_0 : i32, i32
  }
  func.func @transform_9(%arg0: i32) -> (i32, i32) {
    %c0_i32 = arith.constant 0 : i32
    %c0_i32_0 = arith.constant 0 : i32
    %c0_i32_1 = arith.constant 0 : i32
    return %c0_i32, %c0_i32_0 : i32, i32
  }
  func.func @transform_10(%arg0: i32) -> (i32, i32) {
    %c0_i32 = arith.constant 0 : i32
    %c0_i32_0 = arith.constant 0 : i32
    return %arg0, %c0_i32 : i32, i32
  }
  func.func @transform_11(%arg0: i32) -> (i32, i32) {
    %c0_i32 = arith.constant 0 : i32
    %c0_i32_0 = arith.constant 0 : i32
    return %arg0, %c0_i32 : i32, i32
  }
}

module attributes {stable_mosaic.version = 11 : i64} {
  func.func @_lstm_kernel(%arg0: i32, %arg1: memref<128x32xf32, #tpu.memory_space<vmem>>, %arg2: memref<32x64xf32, #tpu.memory_space<vmem>>, %arg3: memref<16x64xf32, #tpu.memory_space<vmem>>, %arg4: memref<1x64xf32, #tpu.memory_space<vmem>>, %arg5: memref<128x16xf32, #tpu.memory_space<vmem>>, %arg6: memref<128x64xf32, #tpu.memory_space<vmem>>) attributes {dimension_semantics = [#tpu.dimension_semantics<arbitrary>], iteration_bounds = array<i64: 1>, scalar_prefetch = 0 : i64, scratch_operands = 1 : i64, tpu.core_type = #tpu.core_type<tc>, window_params = [{pipeline_mode = #tpu.pipeline_mode<synchronous>, transform_indices = @transform_0, window_bounds = array<i64: 128, 32>}, {pipeline_mode = #tpu.pipeline_mode<synchronous>, transform_indices = @transform_1, window_bounds = array<i64: 32, 64>}, {pipeline_mode = #tpu.pipeline_mode<synchronous>, transform_indices = @transform_2, window_bounds = array<i64: 16, 64>}, {pipeline_mode = #tpu.pipeline_mode<synchronous>, transform_indices = @transform_3, window_bounds = array<i64: 1, 64>}, {pipeline_mode = #tpu.pipeline_mode<synchronous>, transform_indices = @transform_4, window_bounds = array<i64: 128, 16>}]} {
    %c0 = arith.constant 0 : index
    %c0_0 = arith.constant 0 : index
    %0 = vector.load %arg1[%c0, %c0_0] : memref<128x32xf32, #tpu.memory_space<vmem>>, vector<128x32xf32>
    %c0_1 = arith.constant 0 : index
    %c0_2 = arith.constant 0 : index
    %1 = vector.load %arg2[%c0_1, %c0_2] : memref<32x64xf32, #tpu.memory_space<vmem>>, vector<32x64xf32>
    %cst = arith.constant dense<0.000000e+00> : vector<128x64xf32>
    %2 = tpu.matmul %0, %1, %cst {dimension_numbers = #tpu.dot_dimension_numbers<[1], [0], [0], [1], [0, 0, 1, 1], [], []>} : vector<128x32xf32>, vector<32x64xf32>, vector<128x64xf32> -> vector<128x64xf32>
    %c0_3 = arith.constant 0 : index
    %c0_4 = arith.constant 0 : index
    %3 = vector.load %arg4[%c0_3, %c0_4] : memref<1x64xf32, #tpu.memory_space<vmem>>, vector<1x64xf32>
    %4 = vector.broadcast %3 : vector<1x64xf32> to vector<128x64xf32>
    %5 = arith.addf %2, %4 : vector<128x64xf32>
    %c0_5 = arith.constant 0 : index
    %c0_6 = arith.constant 0 : index
    %6 = vector.load %arg6[%c0_5, %c0_6] : memref<128x64xf32, #tpu.memory_space<vmem>>, vector<128x64xf32>
    tpu.vector_store %arg6[%c0_5, %c0_6], %5 {strides = array<i32>} : memref<128x64xf32, #tpu.memory_space<vmem>>, vector<128x64xf32>,
    %c0_7 = arith.constant 0 : index
    %c0_8 = arith.constant 0 : index
    %7 = vector.load %arg3[%c0_7, %c0_8] : memref<16x64xf32, #tpu.memory_space<vmem>>, vector<16x64xf32>
    %cst_9 = arith.constant 0.000000e+00 : f32
    %8 = vector.broadcast %cst_9 : f32 to vector<32x16xf32>
    %c0_i32 = arith.constant 0 : i32
    %c32_i32 = arith.constant 32 : i32
    %9 = arith.muli %c0_i32, %c32_i32 : i32
    %10 = arith.index_cast %9 : i32 to index
    %c0_10 = arith.constant 0 : index
    %11 = vector.load %arg6[%10, %c0_10] : memref<128x64xf32, #tpu.memory_space<vmem>>, vector<32x64xf32>
    %cst_11 = arith.constant dense<0.000000e+00> : vector<32x64xf32>
    %12 = tpu.matmul %8, %7, %cst_11 {dimension_numbers = #tpu.dot_dimension_numbers<[1], [0], [0], [1], [0, 0, 1, 1], [], []>} : vector<32x16xf32>, vector<16x64xf32>, vector<32x64xf32> -> vector<32x64xf32>
    %13 = arith.addf %11, %12 : vector<32x64xf32>
    %14 = vector.extract_strided_slice %13 {offsets = [0, 0], sizes = [32, 16], strides = [1, 1]} : vector<32x64xf32> to vector<32x16xf32>
    %15 = arith.negf %14 : vector<32x16xf32>
    %16 = math.exp %15 : vector<32x16xf32>
    %cst_12 = arith.constant 1.000000e+00 : f32
    %17 = vector.broadcast %cst_12 : f32 to vector<32x16xf32>
    %18 = arith.addf %17, %16 : vector<32x16xf32>
    %19 = arith.divf %17, %18 : vector<32x16xf32>
    %20 = vector.extract_strided_slice %13 {offsets = [0, 16], sizes = [32, 16], strides = [1, 1]} : vector<32x64xf32> to vector<32x16xf32>
    %21 = arith.negf %20 : vector<32x16xf32>
    %22 = math.exp %21 : vector<32x16xf32>
    %cst_13 = arith.constant 1.000000e+00 : f32
    %23 = vector.broadcast %cst_13 : f32 to vector<32x16xf32>
    %24 = arith.addf %23, %22 : vector<32x16xf32>
    %25 = arith.divf %23, %24 : vector<32x16xf32>
    %26 = vector.extract_strided_slice %13 {offsets = [0, 32], sizes = [32, 16], strides = [1, 1]} : vector<32x64xf32> to vector<32x16xf32>
    %27 = math.tanh %26 : vector<32x16xf32>
    %28 = vector.extract_strided_slice %13 {offsets = [0, 48], sizes = [32, 16], strides = [1, 1]} : vector<32x64xf32> to vector<32x16xf32>
    %29 = arith.negf %28 : vector<32x16xf32>
    %30 = math.exp %29 : vector<32x16xf32>
    %cst_14 = arith.constant 1.000000e+00 : f32
    %31 = vector.broadcast %cst_14 : f32 to vector<32x16xf32>
    %32 = arith.addf %31, %30 : vector<32x16xf32>
    %33 = arith.divf %31, %32 : vector<32x16xf32>
    %34 = arith.mulf %25, %8 : vector<32x16xf32>
    %35 = arith.mulf %19, %27 : vector<32x16xf32>
    %36 = arith.addf %34, %35 : vector<32x16xf32>
    %37 = math.tanh %36 : vector<32x16xf32>
    %38 = arith.mulf %33, %37 : vector<32x16xf32>
    %39 = arith.index_cast %9 : i32 to index
    %c0_15 = arith.constant 0 : index
    %40 = vector.load %arg5[%39, %c0_15] : memref<128x16xf32, #tpu.memory_space<vmem>>, vector<32x16xf32>
    tpu.vector_store %arg5[%39, %c0_15], %38 {strides = array<i32>} : memref<128x16xf32, #tpu.memory_space<vmem>>, vector<32x16xf32>,
    %c1_i32 = arith.constant 1 : i32
    %c32_i32_16 = arith.constant 32 : i32
    %41 = arith.muli %c1_i32, %c32_i32_16 : i32
    %42 = arith.index_cast %41 : i32 to index
    %c0_17 = arith.constant 0 : index
    %43 = vector.load %arg6[%42, %c0_17] : memref<128x64xf32, #tpu.memory_space<vmem>>, vector<32x64xf32>
    %cst_18 = arith.constant dense<0.000000e+00> : vector<32x64xf32>
    %44 = tpu.matmul %38, %7, %cst_18 {dimension_numbers = #tpu.dot_dimension_numbers<[1], [0], [0], [1], [0, 0, 1, 1], [], []>} : vector<32x16xf32>, vector<16x64xf32>, vector<32x64xf32> -> vector<32x64xf32>
    %45 = arith.addf %43, %44 : vector<32x64xf32>
    %46 = vector.extract_strided_slice %45 {offsets = [0, 0], sizes = [32, 16], strides = [1, 1]} : vector<32x64xf32> to vector<32x16xf32>
    %47 = arith.negf %46 : vector<32x16xf32>
    %48 = math.exp %47 : vector<32x16xf32>
    %cst_19 = arith.constant 1.000000e+00 : f32
    %49 = vector.broadcast %cst_19 : f32 to vector<32x16xf32>
    %50 = arith.addf %49, %48 : vector<32x16xf32>
    %51 = arith.divf %49, %50 : vector<32x16xf32>
    %52 = vector.extract_strided_slice %45 {offsets = [0, 16], sizes = [32, 16], strides = [1, 1]} : vector<32x64xf32> to vector<32x16xf32>
    %53 = arith.negf %52 : vector<32x16xf32>
    %54 = math.exp %53 : vector<32x16xf32>
    %cst_20 = arith.constant 1.000000e+00 : f32
    %55 = vector.broadcast %cst_20 : f32 to vector<32x16xf32>
    %56 = arith.addf %55, %54 : vector<32x16xf32>
    %57 = arith.divf %55, %56 : vector<32x16xf32>
    %58 = vector.extract_strided_slice %45 {offsets = [0, 32], sizes = [32, 16], strides = [1, 1]} : vector<32x64xf32> to vector<32x16xf32>
    %59 = math.tanh %58 : vector<32x16xf32>
    %60 = vector.extract_strided_slice %45 {offsets = [0, 48], sizes = [32, 16], strides = [1, 1]} : vector<32x64xf32> to vector<32x16xf32>
    %61 = arith.negf %60 : vector<32x16xf32>
    %62 = math.exp %61 : vector<32x16xf32>
    %cst_21 = arith.constant 1.000000e+00 : f32
    %63 = vector.broadcast %cst_21 : f32 to vector<32x16xf32>
    %64 = arith.addf %63, %62 : vector<32x16xf32>
    %65 = arith.divf %63, %64 : vector<32x16xf32>
    %66 = arith.mulf %57, %36 : vector<32x16xf32>
    %67 = arith.mulf %51, %59 : vector<32x16xf32>
    %68 = arith.addf %66, %67 : vector<32x16xf32>
    %69 = math.tanh %68 : vector<32x16xf32>
    %70 = arith.mulf %65, %69 : vector<32x16xf32>
    %71 = arith.index_cast %41 : i32 to index
    %c0_22 = arith.constant 0 : index
    %72 = vector.load %arg5[%71, %c0_22] : memref<128x16xf32, #tpu.memory_space<vmem>>, vector<32x16xf32>
    tpu.vector_store %arg5[%71, %c0_22], %70 {strides = array<i32>} : memref<128x16xf32, #tpu.memory_space<vmem>>, vector<32x16xf32>,
    %c2_i32 = arith.constant 2 : i32
    %c32_i32_23 = arith.constant 32 : i32
    %73 = arith.muli %c2_i32, %c32_i32_23 : i32
    %74 = arith.index_cast %73 : i32 to index
    %c0_24 = arith.constant 0 : index
    %75 = vector.load %arg6[%74, %c0_24] : memref<128x64xf32, #tpu.memory_space<vmem>>, vector<32x64xf32>
    %cst_25 = arith.constant dense<0.000000e+00> : vector<32x64xf32>
    %76 = tpu.matmul %70, %7, %cst_25 {dimension_numbers = #tpu.dot_dimension_numbers<[1], [0], [0], [1], [0, 0, 1, 1], [], []>} : vector<32x16xf32>, vector<16x64xf32>, vector<32x64xf32> -> vector<32x64xf32>
    %77 = arith.addf %75, %76 : vector<32x64xf32>
    %78 = vector.extract_strided_slice %77 {offsets = [0, 0], sizes = [32, 16], strides = [1, 1]} : vector<32x64xf32> to vector<32x16xf32>
    %79 = arith.negf %78 : vector<32x16xf32>
    %80 = math.exp %79 : vector<32x16xf32>
    %cst_26 = arith.constant 1.000000e+00 : f32
    %81 = vector.broadcast %cst_26 : f32 to vector<32x16xf32>
    %82 = arith.addf %81, %80 : vector<32x16xf32>
    %83 = arith.divf %81, %82 : vector<32x16xf32>
    %84 = vector.extract_strided_slice %77 {offsets = [0, 16], sizes = [32, 16], strides = [1, 1]} : vector<32x64xf32> to vector<32x16xf32>
    %85 = arith.negf %84 : vector<32x16xf32>
    %86 = math.exp %85 : vector<32x16xf32>
    %cst_27 = arith.constant 1.000000e+00 : f32
    %87 = vector.broadcast %cst_27 : f32 to vector<32x16xf32>
    %88 = arith.addf %87, %86 : vector<32x16xf32>
    %89 = arith.divf %87, %88 : vector<32x16xf32>
    %90 = vector.extract_strided_slice %77 {offsets = [0, 32], sizes = [32, 16], strides = [1, 1]} : vector<32x64xf32> to vector<32x16xf32>
    %91 = math.tanh %90 : vector<32x16xf32>
    %92 = vector.extract_strided_slice %77 {offsets = [0, 48], sizes = [32, 16], strides = [1, 1]} : vector<32x64xf32> to vector<32x16xf32>
    %93 = arith.negf %92 : vector<32x16xf32>
    %94 = math.exp %93 : vector<32x16xf32>
    %cst_28 = arith.constant 1.000000e+00 : f32
    %95 = vector.broadcast %cst_28 : f32 to vector<32x16xf32>
    %96 = arith.addf %95, %94 : vector<32x16xf32>
    %97 = arith.divf %95, %96 : vector<32x16xf32>
    %98 = arith.mulf %89, %68 : vector<32x16xf32>
    %99 = arith.mulf %83, %91 : vector<32x16xf32>
    %100 = arith.addf %98, %99 : vector<32x16xf32>
    %101 = math.tanh %100 : vector<32x16xf32>
    %102 = arith.mulf %97, %101 : vector<32x16xf32>
    %103 = arith.index_cast %73 : i32 to index
    %c0_29 = arith.constant 0 : index
    %104 = vector.load %arg5[%103, %c0_29] : memref<128x16xf32, #tpu.memory_space<vmem>>, vector<32x16xf32>
    tpu.vector_store %arg5[%103, %c0_29], %102 {strides = array<i32>} : memref<128x16xf32, #tpu.memory_space<vmem>>, vector<32x16xf32>,
    %c3_i32 = arith.constant 3 : i32
    %c32_i32_30 = arith.constant 32 : i32
    %105 = arith.muli %c3_i32, %c32_i32_30 : i32
    %106 = arith.index_cast %105 : i32 to index
    %c0_31 = arith.constant 0 : index
    %107 = vector.load %arg6[%106, %c0_31] : memref<128x64xf32, #tpu.memory_space<vmem>>, vector<32x64xf32>
    %cst_32 = arith.constant dense<0.000000e+00> : vector<32x64xf32>
    %108 = tpu.matmul %102, %7, %cst_32 {dimension_numbers = #tpu.dot_dimension_numbers<[1], [0], [0], [1], [0, 0, 1, 1], [], []>} : vector<32x16xf32>, vector<16x64xf32>, vector<32x64xf32> -> vector<32x64xf32>
    %109 = arith.addf %107, %108 : vector<32x64xf32>
    %110 = vector.extract_strided_slice %109 {offsets = [0, 0], sizes = [32, 16], strides = [1, 1]} : vector<32x64xf32> to vector<32x16xf32>
    %111 = arith.negf %110 : vector<32x16xf32>
    %112 = math.exp %111 : vector<32x16xf32>
    %cst_33 = arith.constant 1.000000e+00 : f32
    %113 = vector.broadcast %cst_33 : f32 to vector<32x16xf32>
    %114 = arith.addf %113, %112 : vector<32x16xf32>
    %115 = arith.divf %113, %114 : vector<32x16xf32>
    %116 = vector.extract_strided_slice %109 {offsets = [0, 16], sizes = [32, 16], strides = [1, 1]} : vector<32x64xf32> to vector<32x16xf32>
    %117 = arith.negf %116 : vector<32x16xf32>
    %118 = math.exp %117 : vector<32x16xf32>
    %cst_34 = arith.constant 1.000000e+00 : f32
    %119 = vector.broadcast %cst_34 : f32 to vector<32x16xf32>
    %120 = arith.addf %119, %118 : vector<32x16xf32>
    %121 = arith.divf %119, %120 : vector<32x16xf32>
    %122 = vector.extract_strided_slice %109 {offsets = [0, 32], sizes = [32, 16], strides = [1, 1]} : vector<32x64xf32> to vector<32x16xf32>
    %123 = math.tanh %122 : vector<32x16xf32>
    %124 = vector.extract_strided_slice %109 {offsets = [0, 48], sizes = [32, 16], strides = [1, 1]} : vector<32x64xf32> to vector<32x16xf32>
    %125 = arith.negf %124 : vector<32x16xf32>
    %126 = math.exp %125 : vector<32x16xf32>
    %cst_35 = arith.constant 1.000000e+00 : f32
    %127 = vector.broadcast %cst_35 : f32 to vector<32x16xf32>
    %128 = arith.addf %127, %126 : vector<32x16xf32>
    %129 = arith.divf %127, %128 : vector<32x16xf32>
    %130 = arith.mulf %121, %100 : vector<32x16xf32>
    %131 = arith.mulf %115, %123 : vector<32x16xf32>
    %132 = arith.addf %130, %131 : vector<32x16xf32>
    %133 = math.tanh %132 : vector<32x16xf32>
    %134 = arith.mulf %129, %133 : vector<32x16xf32>
    %135 = arith.index_cast %105 : i32 to index
    %c0_36 = arith.constant 0 : index
    %136 = vector.load %arg5[%135, %c0_36] : memref<128x16xf32, #tpu.memory_space<vmem>>, vector<32x16xf32>
    tpu.vector_store %arg5[%135, %c0_36], %134 {strides = array<i32>} : memref<128x16xf32, #tpu.memory_space<vmem>>, vector<32x16xf32>,
    %c4_i32 = arith.constant 4 : i32
    return
  }
  func.func @transform_0(%arg0: i32) -> (i32, i32) {
    %c0_i32 = arith.constant 0 : i32
    %c0_i32_0 = arith.constant 0 : i32
    %c0_i32_1 = arith.constant 0 : i32
    return %c0_i32, %c0_i32_0 : i32, i32
  }
  func.func @transform_1(%arg0: i32) -> (i32, i32) {
    %c0_i32 = arith.constant 0 : i32
    %c0_i32_0 = arith.constant 0 : i32
    %c0_i32_1 = arith.constant 0 : i32
    return %c0_i32, %c0_i32_0 : i32, i32
  }
  func.func @transform_2(%arg0: i32) -> (i32, i32) {
    %c0_i32 = arith.constant 0 : i32
    %c0_i32_0 = arith.constant 0 : i32
    %c0_i32_1 = arith.constant 0 : i32
    return %c0_i32, %c0_i32_0 : i32, i32
  }
  func.func @transform_3(%arg0: i32) -> (i32, i32) {
    %c0_i32 = arith.constant 0 : i32
    %c0_i32_0 = arith.constant 0 : i32
    %c0_i32_1 = arith.constant 0 : i32
    return %c0_i32, %c0_i32_0 : i32, i32
  }
  func.func @transform_4(%arg0: i32) -> (i32, i32) {
    %c0_i32 = arith.constant 0 : i32
    %c0_i32_0 = arith.constant 0 : i32
    %c0_i32_1 = arith.constant 0 : i32
    return %c0_i32, %c0_i32_0 : i32, i32
  }
}

</mosaic_0001>

<bundles_post_ra>
// kernel: log1p.2
= control target key start
LH: loop header
LB: loop body
LE: loop exit
PB: predicated region body
PF: predicated region fallthrough
CT: control target
= control target key end

     0   :  { %s31_s0 = inlined_call_operand.vmem [shape: f32[4,32], index: 0, kind: input, shape index: {}]   ;;  %s32_s1 = inlined_call_operand.vmem [shape: f32[4,32], index: 1, kind: output, shape index: {}]  }
   0x1   :  { %v2_v0 = vld [vmem:[%s31_s0] sm:$0xf] }
   0x2   :  { %v3_v1 = vadd.f32 1.0, %v2_v0  ;;  %v6_v2 = vmul.f32 -0.5, %v2_v0  ;;  %v9_v4 = vand.u32 2147483647, %v2_v0 }
   0x4   :  { %13 = vlog2.f32 %v3_v1  ;;  %v7_v3 = vadd.f32 1.0, %v6_v2  ;;  %vm10_vm0 = vcmp.lt.f32.partialorder %v9_v4, 0.0004427343 }
   0x6   :  { %v8_v5 = vmul.f32 %v7_v3, %v2_v0 }
   0xa   :  { %v14_v6 = vpop.eup %13 }
   0xb   :  { %v5_v7 = vmul.f32 0.6931472, %v14_v6 }
   0xd   :  { %v11_v8 = vsel %vm10_vm0, %v8_v5, %v5_v7 }
   0xe   :  { %12 = vst [vmem:[%s32_s1] sm:$0xf] %v11_v8 }

// kernel: dyngraph2vec_forward.2
= control target key start
LH: loop header
LB: loop body
LE: loop exit
PB: predicated region body
PF: predicated region fallthrough
CT: control target
= control target key end

     0   :  { %s1117_s19 = smov 0   ;;  %s1303_s0 = inlined_call_operand.vmem [shape: f32[128,32], index: 0, kind: input, shape index: {}]   ;;  %s1304_s1 = inlined_call_operand.vmem [shape: f32[128,1], index: 1, kind: input, shape index: {}]   ;;  %s1305_s2 = inlined_call_operand.vmem [shape: bf16[32,128], index: 2, kind: input, shape index: {}]   ;;  %s1306_s3 = inlined_call_operand.vmem [shape: f32[1,128], index: 3, kind: input, shape index: {}]   ;;  %s1307_s4 = inlined_call_operand.vmem [shape: bf16[128,64], index: 4, kind: input, shape index: {}]   ;;  %s1308_s5 = inlined_call_operand.vmem [shape: f32[1,64], index: 5, kind: input, shape index: {}]   ;;  %s1309_s6 = inlined_call_operand.vmem [shape: bf16[32,32], index: 6, kind: input, shape index: {}]   ;;  %s1310_s7 = inlined_call_operand.vmem [shape: f32[1,32], index: 7, kind: input, shape index: {}]   ;;  %s1311_s8 = inlined_call_operand.vmem [shape: f32[32,1], index: 8, kind: input, shape index: {}]   ;;  %s1312_s9 = inlined_call_operand.<no memory space> [shape: f32[1,1], index: 9, kind: input, shape index: {}]   ;;  %s1313_s10 = inlined_call_operand.vmem [shape: f32[128,32], index: 10, kind: output, shape index: {0}]   ;;  %s1314_s11 = inlined_call_operand.vmem [shape: f32[128,1], index: 11, kind: output, shape index: {1}]  }
   0x1   :  { %v17_v0 = vstv %s1312_s9 }
   0x2   :  { %18 = vst [vmem:[#allocation2] sm:$0x1] %v17_v0 }
   0x3 LB: > { %s933_s20 = sadd.s32 4294967295, %s1051_s19   ;;  %p937_p0 = scmp.ge.s32.totalorder %s1051_s19, 1  ;;  %s1051_s19 = sphi %s1117_s19, %s24_s19  }
   0x4   : > { %p354_p1 = scmp.lt.s32.totalorder %s1051_s19, 3 }
   0x6   : > { %p355_p2 = pnand %p937_p0, %p354_p1 }
   0x7   : > { %s938_s9 = sshll.u32 (!%p355_p2), %s933_s20, 3  ;;  %s1053_s12 = smov (!%p355_p2), 96  }
   0x8   : > { %358 = sbr.rel (%p355_p2) target bundleno = 609 (0x261), region = 60  ;;  %p405_p3 = scmp.lt.s32.totalorder (!%p355_p2), %s938_s9, 15 }
   0xd   : > { %v1013_v1 = vld [vmem:[%s1305_s2 + $0x8] sm:$0xff]  ;;  %v1012_v2 = vld [vmem:[%s1305_s2] sm:$0xff]  ;;  %s1316_s9 = smov (!%p405_p3, %s938_s9), 15  ;;  %vm461_vm0 = vcmask 261120   ;;  %v1021_v9 = vld [vmem:[%s1307_s4 + $0x38] sm:$0xff]  ;;  %vm822_vm1 = vcmask 7168  }
   0xe   : > { %480 = vmatpush.bf16.msra.mxu0 %v1013_v1  ;;  %s1131_s25 = sshll.u32 %s1316_s9, 3  ;;  %v1020_v10 = vld [vmem:[%s1307_s4 + $0x30] sm:$0xff]  ;;  %1024 = vmatpush.bf16.msra.mxu1 %v1021_v9  ;;  %v1019_v11 = vld [vmem:[%s1307_s4 + $0x28] sm:$0xff]  ;;  %v1018_v14 = vld [vmem:[%s1307_s4 + $0x20] sm:$0xff] }
   0xf   : > { %s1137_s28 = scalar_lea.vmem %s1303_s0, %s1131_s25  ;;  %v1017_v16 = vld [vmem:[%s1307_s4 + $0x18] sm:$0xff]  ;;  %v1016_v17 = vld [vmem:[%s1307_s4 + $0x10] sm:$0xff]  ;;  %v1015_v18 = vld [vmem:[%s1307_s4 + $0x8] sm:$0xff]  ;;  %s1223_s29 = scalar_lea.vmem %s1304_s1, %s1131_s25 }
  0x10   : > { %v429_v3 = vld [vmem:[%s1137_s28] sm:$0xff]  ;;  %v430_v4 = vld [vmem:[%s1137_s28 + $0x8] sm:$0xff]  ;;  %v431_v6 = vld [vmem:[%s1137_s28 + $0x10] sm:$0xff]  ;;  %s1248_s17 = scalar_lea.vmem %s1313_s10, %s1131_s25 }
  0x11   : > { %v437_v5 = vpack.c.bf16 %v430_v4, %v429_v3  ;;  %v432_v7 = vld [vmem:[%s1137_s28 + $0x18] sm:$0xff]  ;;  %v433_v12 = vld [vmem:[%s1137_s28 + $0x20] sm:$0xff]  ;;  %v434_v13 = vld [vmem:[%s1137_s28 + $0x28] sm:$0xff] }
  0x12   : > { %481 = vmatpush.bf16.msra.mxu0 %v1012_v2  ;;  %v438_v8 = vpack.c.bf16 %v432_v7, %v431_v6  ;;  %1025 = vmatpush.bf16.msra.mxu1 %v1020_v10  ;;  %v439_v15 = vpack.c.bf16 %v434_v13, %v433_v12  ;;  %v435_v19 = vld [vmem:[%s1137_s28 + $0x30] sm:$0xff]  ;;  %v436_v20 = vld [vmem:[%s1137_s28 + $0x38] sm:$0xff]  ;;  %v1014_v22 = vld [vmem:[%s1307_s4] sm:$0xff] }
  0x13   : > { %v440_v21 = vpack.c.bf16 %v436_v20, %v435_v19  ;;  %v1041_v24 = vld [vmem:[%s1306_s3] ss:$0 sm:$0xff]  ;;  %v736_v1 = vld [vmem:[%s1311_s8 + $0x18] sm:$0xff]  ;;  %v735_v2 = vld [vmem:[%s1311_s8 + $0x10] sm:$0xff] }
  0x14   : > { %v1042_v52 = vld [vmem:[%s1308_s5] ss:$0 sm:$0xff]  ;;  %769 = vmatpush.msra.mxu3 %v736_v1  ;;  %v734_v3 = vld [vmem:[%s1311_s8 + $0x8] sm:$0xff] }
  0x15   : > { %954 = vmatmul.msk.bf16.vlgmr.msra.gmra.mxu0 %vm461_vm0, %v437_v5  ;;  %v733_v6 = vld [vmem:[%s1311_s8] sm:$0xff] }
  0x16   : > { %583 = vmatpush.bf16.msrb.mxu0 %v1021_v9  ;;  %1026 = vmatpush.bf16.msra.mxu1 %v1019_v11 }
  0x17   : > { %770 = vmatpush.msra.mxu3 %v735_v2 }
  0x19   : > { %771 = vmatpush.msra.mxu3 %v734_v3 }
  0x1a   : > { %584 = vmatpush.bf16.msrb.mxu0 %v1020_v10  ;;  %1027 = vmatpush.bf16.msra.mxu1 %v1018_v14 }
  0x1b   : > { %772 = vmatpush.msra.mxu3 %v733_v6 }
  0x1e   : > { %585 = vmatpush.bf16.msrb.mxu0 %v1019_v11  ;;  %1028 = vmatpush.bf16.msra.mxu1 %v1017_v16 }
  0x22   : > { %586 = vmatpush.bf16.msrb.mxu0 %v1018_v14  ;;  %1029 = vmatpush.bf16.msra.mxu1 %v1016_v17 }
  0x25   : > { %955 = vmatmul.msk.bf16.gmra.mxu0 %vm461_vm0, %v438_v8 }
  0x26   : > { %587 = vmatpush.bf16.msrb.mxu0 %v1017_v16  ;;  %1030 = vmatpush.bf16.msra.mxu1 %v1015_v18 }
  0x2a   : > { %588 = vmatpush.bf16.msrb.mxu0 %v1016_v17  ;;  %1031 = vmatpush.bf16.msra.mxu1 %v1014_v22  ;;  %v1023_v17 = vld [vmem:[%s1309_s6 + $0x8] sm:$0xff] }
  0x2b   : > { %702 = vmatpush.bf16.msra.mxu2 %v1023_v17 }
  0x2e   : > { %589 = vmatpush.bf16.msrb.mxu0 %v1015_v18  ;;  %v1022_v18 = vld [vmem:[%s1309_s6] sm:$0xff] }
  0x2f   : > { %703 = vmatpush.bf16.msra.mxu2 %v1022_v18  ;;  %v804_v18 = vld [vmem:[%s1223_s29 + $0x30] sm:$0xff] }
  0x32   : > { %590 = vmatpush.bf16.msrb.mxu0 %v1014_v22 }
  0x35   : > { %956 = vmatmul.msk.bf16.gmra.mxu0 %vm461_vm0, %v439_v15 }
  0x45   : > { %957 = vmatmul.msk.bf16.gmra.mxu0 %vm461_vm0, %v440_v21 }
  0x92   : > { %v483_v23 = vpop.f32.mrf.mxu0 }
  0x93   : > { %v484_v25 = vadd.f32 %v1041_v24, %v483_v23 }
  0x95   : > { %v503_v28 = vmax.f32 %v484_v25, 0.0 }
  0x9a   : > { %v485_v26 = vpop.f32.mrf.mxu0 }
  0x9b   : > { %v486_v27 = vadd.f32 %v1041_v24, %v485_v26 }
  0x9d   : > { %v504_v29 = vmax.f32 %v486_v27, 0.0 }
  0x9f   : > { %v511_v30 = vpack.c.bf16 %v504_v29, %v503_v28 }
  0xa1   : > { %591 = vmatmul.bf16.vlgmr.msrb.gmra.mxu0 %v511_v30 }
  0xa2   : > { %v488_v31 = vpop.f32.mrf.mxu0 }
  0xa3   : > { %v489_v32 = vadd.f32 %v1041_v24, %v488_v31 }
  0xa5   : > { %v505_v35 = vmax.f32 %v489_v32, 0.0 }
  0xaa   : > { %v490_v33 = vpop.f32.mrf.mxu0 }
  0xab   : > { %v491_v34 = vadd.f32 %v1041_v24, %v490_v33 }
  0xad   : > { %v506_v36 = vmax.f32 %v491_v34, 0.0 }
  0xaf   : > { %v512_v37 = vpack.c.bf16 %v506_v36, %v505_v35 }
  0xb1   : > { %596 = vmatmul.bf16.vlgmr.msra.gmra.mxu1 %v512_v37 }
  0xb2   : > { %v493_v38 = vpop.f32.mrf.mxu0 }
  0xb3   : > { %v494_v39 = vadd.f32 %v1041_v24, %v493_v38 }
  0xb5   : > { %v507_v42 = vmax.f32 %v494_v39, 0.0  ;;  %v1225_v39 = vld [vmem:[#allocation2] ss:$0 sm:$0xff] }
  0xba   : > { %v495_v40 = vpop.f32.mrf.mxu0 }
  0xbb   : > { %v496_v41 = vadd.f32 %v1041_v24, %v495_v40 }
  0xbd   : > { %v508_v43 = vmax.f32 %v496_v41, 0.0  ;;  %v798_v41 = vld [vmem:[%s1223_s29] sm:$0xff] }
  0xbf   : > { %v513_v44 = vpack.c.bf16 %v508_v43, %v507_v42 }
  0xc1   : > { %601 = vmatmul.bf16.gmra.mxu1 %v513_v44 }
  0xc2   : > { %v498_v45 = vpop.f32.mrf.mxu0 }
  0xc3   : > { %v499_v46 = vadd.f32 %v1041_v24, %v498_v45 }
  0xc5   : > { %v509_v49 = vmax.f32 %v499_v46, 0.0  ;;  %v799_v46 = vld [vmem:[%s1223_s29 + $0x8] sm:$0xff] }
  0xca   : > { %v500_v47 = vpop.f32.mrf.mxu0 }
  0xcb   : > { %v501_v48 = vadd.f32 %v1041_v24, %v500_v47 }
  0xcd   : > { %v510_v50 = vmax.f32 %v501_v48, 0.0  ;;  %v1242_v48 = vld [vmem:[%s1310_s7] ss:$0 sm:$0xff] }
  0xcf   : > { %v514_v51 = vpack.c.bf16 %v510_v50, %v509_v49 }
  0xd1   : > { %606 = vmatmul.bf16.gmra.mxu1 %v514_v51 }
 0x11e   : > { %v592_v53 = vpop.f32.mrf.mxu0 }
 0x11f   : > { %v593_v54 = vadd.f32 %v1042_v52, %v592_v53 }
 0x121   : > { %v612_v55 = vmax.f32 %v593_v54, 0.0  ;;  %v800_v54 = vld [vmem:[%s1223_s29 + $0x10] sm:$0xff] }
 0x123   : > { %628 = vrot.lane.b32.xlu0 %v612_v55, %s1053_s12 }
 0x126   : > { %v594_v56 = vpop.f32.mrf.mxu0 }
 0x127   : > { %v595_v57 = vadd.f32 %v1042_v52, %v594_v56 }
 0x129   : > { %v613_v58 = vmax.f32 %v595_v57, 0.0 }
 0x12b   : > { %630 = vrot.lane.b32.xlu0 %v613_v58, %s1053_s12 }
 0x12e   : > { %v597_v59 = vpop.f32.mrf.mxu1 }
 0x12f   : > { %v598_v60 = vadd.f32 %v1042_v52, %v597_v59 }
 0x131   : > { %v614_v61 = vmax.f32 %v598_v60, 0.0 }
 0x133   : > { %632 = vrot.lane.b32.xlu1 %v614_v61, %s1053_s12 }
 0x136   : > { %v599_v62 = vpop.f32.mrf.mxu1 }
 0x137   : > { %v600_v63 = vadd.f32 %v1042_v52, %v599_v62 }
 0x139   : > { %v615_v0 = vmax.f32 %v600_v63, 0.0 }
 0x13b   : > { %634 = vrot.lane.b32.xlu1 %v615_v0, %s1053_s12 }
 0x13e   : > { %v602_v4 = vpop.f32.mrf.mxu1 }
 0x13f   : > { %v603_v5 = vadd.f32 %v1042_v52, %v602_v4  ;;  %v802_v4 = vld [vmem:[%s1223_s29 + $0x20] sm:$0xff] }
 0x141   : > { %v616_v7 = vmax.f32 %v603_v5, 0.0 }
 0x143   : > { %636 = vrot.lane.b32.xlu2 %v616_v7, %s1053_s12 }
 0x146   : > { %v604_v8 = vpop.f32.mrf.mxu1 }
 0x147   : > { %v605_v9 = vadd.f32 %v1042_v52, %v604_v8 }
 0x149   : > { %v617_v10 = vmax.f32 %v605_v9, 0.0 }
 0x14b   : > { %638 = vrot.lane.b32.xlu2 %v617_v10, %s1053_s12 }
 0x14e   : > { %v607_v11 = vpop.f32.mrf.mxu1 }
 0x14f   : > { %v608_v12 = vadd.f32 %v1042_v52, %v607_v11  ;;  %v803_v11 = vld [vmem:[%s1223_s29 + $0x28] sm:$0xff] }
 0x151   : > { %v618_v13 = vmax.f32 %v608_v12, 0.0 }
 0x153   : > { %640 = vrot.lane.b32.xlu0 %v618_v13, %s1053_s12 }
 0x156   : > { %v609_v14 = vpop.f32.mrf.mxu1 }
 0x157   : > { %v610_v15 = vadd.f32 %v1042_v52, %v609_v14 }
 0x159   : > { %v619_v16 = vmax.f32 %v610_v15, 0.0 }
 0x15b   : > { %642 = vrot.lane.b32.xlu1 %v619_v16, %s1053_s12  ;;  %s1233_s12 = scalar_lea.vmem %s1314_s11, %s1131_s25 }
 0x195   : > { %v629_v19 = vpop.permute.xlu0 %628 }
 0x196   : > { %1002 = vmatmul.msk.f32.vlgmr.msra.gmra.mxu3 %vm461_vm0, %v629_v19  ;;  %v652_v21 = vadd.f32 %v629_v19, %v612_v55 }
 0x19d   : > { %v631_v20 = vpop.permute.xlu0 %630  ;;  %v637_v28 = vpop.permute.xlu2 %636 }
 0x19e   : > { %v653_v22 = vadd.f32 %v631_v20, %v613_v58  ;;  %1003 = vmatmul.msk.f32.gmra.mxu3 %vm461_vm0, %v631_v20  ;;  %v656_v32 = vadd.f32 %v637_v28, %v616_v7 }
 0x1a0   : > { %v660_v23 = vpack.c.bf16 %v653_v22, %v652_v21 }
 0x1a2   : > { %998 = vmatmul.msk.bf16.vlgmr.msra.gmra.mxu2 %vm461_vm0, %v660_v23 }
 0x1a5   : > { %v633_v24 = vpop.permute.xlu1 %632  ;;  %v639_v30 = vpop.permute.xlu2 %638 }
 0x1a6   : > { %1004 = vmatmul.msk.f32.gmra.mxu3 %vm461_vm0, %v633_v24  ;;  %v654_v26 = vadd.f32 %v633_v24, %v614_v61  ;;  %v657_v31 = vadd.f32 %v639_v30, %v617_v10  ;;  %v801_v61 = vld [vmem:[%s1223_s29 + $0x18] sm:$0xff] }
 0x1a8   : > { %v662_v33 = vpack.c.bf16 %v657_v31, %v656_v32 }
 0x1ad   : > { %v635_v25 = vpop.permute.xlu1 %634 }
 0x1ae   : > { %v655_v27 = vadd.f32 %v635_v25, %v615_v0  ;;  %1005 = vmatmul.msk.f32.gmra.mxu3 %vm461_vm0, %v635_v25  ;;  %v805_v25 = vld [vmem:[%s1223_s29 + $0x38] sm:$0xff] }
 0x1b0   : > { %v661_v29 = vpack.c.bf16 %v655_v27, %v654_v26 }
 0x1b2   : > { %999 = vmatmul.msk.bf16.gmra.mxu2 %vm461_vm0, %v661_v29 }
 0x1b6   : > { %1006 = vmatmul.msk.f32.gmra.mxu3 %vm461_vm0, %v637_v28 }
 0x1be   : > { %1007 = vmatmul.msk.f32.gmra.mxu3 %vm461_vm0, %v639_v30 }
 0x1c2   : > { %1000 = vmatmul.msk.bf16.gmra.mxu2 %vm461_vm0, %v662_v33 }
 0x1c5   : > { %v641_v34 = vpop.permute.xlu0 %640 }
 0x1c6   : > { %1008 = vmatmul.msk.f32.gmra.mxu3 %vm461_vm0, %v641_v34  ;;  %v658_v36 = vadd.f32 %v641_v34, %v618_v13 }
 0x1cd   : > { %v643_v35 = vpop.permute.xlu1 %642 }
 0x1ce   : > { %v659_v37 = vadd.f32 %v643_v35, %v619_v16  ;;  %1009 = vmatmul.msk.f32.gmra.mxu3 %vm461_vm0, %v643_v35 }
 0x1d0   : > { %v663_v38 = vpack.c.bf16 %v659_v37, %v658_v36 }
 0x1d2   : > { %1001 = vmatmul.msk.bf16.gmra.mxu2 %vm461_vm0, %v663_v38 }
 0x219   : > { %v774_v40 = vpop.f32.mrf.mxu3 }
 0x21a   : > { %v775_v42 = vadd.f32 %v1225_v39, %v774_v40 }
 0x21c   : > { %v806_v43 = vsub.f32 %v775_v42, %v798_v41 }
 0x21e   : > { %v814_v44 = vmul.f32 %v806_v43, %v806_v43 }
 0x220   : > { %823 = vst.msk [vmem:[%s1233_s12] sm:$0xff] %vm822_vm1, %v814_v44 }
 0x221   : > { %v777_v45 = vpop.f32.mrf.mxu3 }
 0x222   : > { %v778_v47 = vadd.f32 %v1225_v39, %v777_v45 }
 0x224   : > { %v807_v49 = vsub.f32 %v778_v47, %v799_v46 }
 0x225   : > { %v705_v50 = vpop.f32.mrf.mxu2 }
 0x226   : > { %v815_v51 = vmul.f32 %v807_v49, %v807_v49  ;;  %v706_v52 = vadd.f32 %v1242_v48, %v705_v50 }
 0x228   : > { %824 = vst.msk [vmem:[%s1233_s12 + $0x8] sm:$0xff] %vm822_vm1, %v815_v51 }
 0x229   : > { %725 = vst.msk [vmem:[%s1248_s17] sm:$0xff] %vm461_vm0, %v706_v52  ;;  %v780_v53 = vpop.f32.mrf.mxu3 }
 0x22a   : > { %v781_v55 = vadd.f32 %v1225_v39, %v780_v53 }
 0x22c   : > { %v808_v56 = vsub.f32 %v781_v55, %v800_v54 }
 0x22d   : > { %v707_v57 = vpop.f32.mrf.mxu2 }
 0x22e   : > { %v816_v58 = vmul.f32 %v808_v56, %v808_v56  ;;  %v708_v59 = vadd.f32 %v1242_v48, %v707_v57 }
 0x230   : > { %825 = vst.msk [vmem:[%s1233_s12 + $0x10] sm:$0xff] %vm822_vm1, %v816_v58 }
 0x231   : > { %726 = vst.msk [vmem:[%s1248_s17 + $0x8] sm:$0xff] %vm461_vm0, %v708_v59  ;;  %v783_v60 = vpop.f32.mrf.mxu3 }
 0x232   : > { %v784_v62 = vadd.f32 %v1225_v39, %v783_v60 }
 0x234   : > { %v809_v63 = vsub.f32 %v784_v62, %v801_v61 }
 0x235   : > { %v710_v0 = vpop.f32.mrf.mxu2 }
 0x236   : > { %v817_v1 = vmul.f32 %v809_v63, %v809_v63  ;;  %v711_v2 = vadd.f32 %v1242_v48, %v710_v0 }
 0x238   : > { %826 = vst.msk [vmem:[%s1233_s12 + $0x18] sm:$0xff] %vm822_vm1, %v817_v1 }
 0x239   : > { %727 = vst.msk [vmem:[%s1248_s17 + $0x10] sm:$0xff] %vm461_vm0, %v711_v2  ;;  %v786_v3 = vpop.f32.mrf.mxu3 }
 0x23a   : > { %v787_v5 = vadd.f32 %v1225_v39, %v786_v3 }
 0x23c   : > { %v810_v6 = vsub.f32 %v787_v5, %v802_v4 }
 0x23d   : > { %v712_v7 = vpop.f32.mrf.mxu2 }
 0x23e   : > { %v818_v8 = vmul.f32 %v810_v6, %v810_v6  ;;  %v713_v9 = vadd.f32 %v1242_v48, %v712_v7 }
 0x240   : > { %827 = vst.msk [vmem:[%s1233_s12 + $0x20] sm:$0xff] %vm822_vm1, %v818_v8 }
 0x241   : > { %728 = vst.msk [vmem:[%s1248_s17 + $0x18] sm:$0xff] %vm461_vm0, %v713_v9  ;;  %v789_v10 = vpop.f32.mrf.mxu3 }
 0x242   : > { %v790_v12 = vadd.f32 %v1225_v39, %v789_v10 }
 0x244   : > { %v811_v13 = vsub.f32 %v790_v12, %v803_v11 }
 0x245   : > { %v715_v14 = vpop.f32.mrf.mxu2 }
 0x246   : > { %v819_v15 = vmul.f32 %v811_v13, %v811_v13  ;;  %v716_v16 = vadd.f32 %v1242_v48, %v715_v14 }
 0x248   : > { %828 = vst.msk [vmem:[%s1233_s12 + $0x28] sm:$0xff] %vm822_vm1, %v819_v15 }
 0x249   : > { %729 = vst.msk [vmem:[%s1248_s17 + $0x20] sm:$0xff] %vm461_vm0, %v716_v16  ;;  %v792_v17 = vpop.f32.mrf.mxu3 }
 0x24a   : > { %v793_v19 = vadd.f32 %v1225_v39, %v792_v17 }
 0x24c   : > { %v812_v20 = vsub.f32 %v793_v19, %v804_v18 }
 0x24d   : > { %v717_v21 = vpop.f32.mrf.mxu2 }
 0x24e   : > { %v820_v22 = vmul.f32 %v812_v20, %v812_v20  ;;  %v718_v23 = vadd.f32 %v1242_v48, %v717_v21 }
 0x250   : > { %829 = vst.msk [vmem:[%s1233_s12 + $0x30] sm:$0xff] %vm822_vm1, %v820_v22 }
 0x251   : > { %730 = vst.msk [vmem:[%s1248_s17 + $0x28] sm:$0xff] %vm461_vm0, %v718_v23  ;;  %v795_v24 = vpop.f32.mrf.mxu3 }
 0x252   : > { %v796_v26 = vadd.f32 %v1225_v39, %v795_v24 }
 0x254   : > { %v813_v27 = vsub.f32 %v796_v26, %v805_v25 }
 0x255   : > { %v720_v28 = vpop.f32.mrf.mxu2 }
 0x256   : > { %v821_v29 = vmul.f32 %v813_v27, %v813_v27  ;;  %v721_v30 = vadd.f32 %v1242_v48, %v720_v28 }
 0x258   : > { %830 = vst.msk [vmem:[%s1233_s12 + $0x38] sm:$0xff] %vm822_vm1, %v821_v29 }
 0x259   : > { %731 = vst.msk [vmem:[%s1248_s17 + $0x30] sm:$0xff] %vm461_vm0, %v721_v30 }
 0x25d   : > { %v722_v31 = vpop.f32.mrf.mxu2 }
 0x25e   : > { %v723_v32 = vadd.f32 %v1242_v48, %v722_v31 }
 0x260   : > { %732 = vst.msk [vmem:[%s1248_s17 + $0x38] sm:$0xff] %vm461_vm0, %v723_v32 }
 0x261 PF: > { %s24_s19 = sadd.s32 1, %s1051_s19  }
 0x262   : > { %p21_p4 = scmp.ge.s32.totalorder %s24_s19, 4  }
 0x264   :  { %23 = sbr.rel (!%p21_p4) target bundleno = 3 (0x3), region = 105 }

// kernel: dyngraph2vec_forward.3
= control target key start
LH: loop header
LB: loop body
LE: loop exit
PB: predicated region body
PF: predicated region fallthrough
CT: control target
= control target key end

     0   :  { %vm41_vm0 = vcmask 261120   ;;  %v1212_v7 = vmov 0.0   ;;  %vm155_vm1 = vcmask 523264   ;;  %s1214_s9 = smov 16   ;;  %s1215_s10 = smov 32   ;;  %s1584_s1 = inlined_call_operand.vmem [shape: f32[32,64], index: 1, kind: input, shape index: {}]   ;;  %s1585_s2 = inlined_call_operand.vmem [shape: f32[16,64], index: 2, kind: input, shape index: {}]   ;;  %s1586_s0 = inlined_call_operand.vmem [shape: f32[128,32], index: 0, kind: input, shape index: {}]   ;;  %s1587_s3 = inlined_call_operand.vmem [shape: f32[1,64], index: 3, kind: input, shape index: {}]   ;;  %s1588_s4 = inlined_call_operand.vmem [shape: f32[128,16], index: 4, kind: output, shape index: {}]  }
   0x1   :  { %v36_v0 = vld [vmem:[%s1584_s1 + $0x18] sm:$0xff]  ;;  %v35_v1 = vld [vmem:[%s1584_s1 + $0x10] sm:$0xff]  ;;  %v173_v2 = vld [vmem:[%s1585_s2 + $0x8] sm:$0xff]  ;;  %s1216_s11 = smov 80  }
   0x2   :  { %102 = vmatpush.msra.mxu0 %v36_v0  ;;  %1070 = vmatpush.msra.mxu2 %v36_v0  ;;  %v34_v3 = vld [vmem:[%s1584_s1 + $0x8] sm:$0xff]  ;;  %v172_v4 = vld [vmem:[%s1585_s2] sm:$0xff]  ;;  %v19_v9 = vld [vmem:[%s1586_s0 + $0x10] sm:$0xff] }
   0x3   :  { %196 = vmatpush.msra.mxu1 %v173_v2  ;;  %1071 = vmatpush.msra.mxu3 %v36_v0  ;;  %v33_v5 = vld [vmem:[%s1584_s1] sm:$0xff]  ;;  %v18_v8 = vld [vmem:[%s1586_s0 + $0x8] sm:$0xff]  ;;  %v20_v10 = vld [vmem:[%s1586_s0 + $0x18] sm:$0xff] }
   0x4   :  { %103 = vmatpush.msra.mxu0 %v35_v1  ;;  %1072 = vmatpush.msra.mxu2 %v35_v1  ;;  %v17_v6 = vld [vmem:[%s1586_s0] sm:$0xff] }
   0x5   :  { %197 = vmatpush.msra.mxu1 %v172_v4  ;;  %1073 = vmatpush.msra.mxu3 %v35_v1  ;;  %v1279_v11 = vld [vmem:[%s1587_s3] ss:$0 sm:$0xff]  ;;  %s1213_s3 = smov 96  }
   0x6   :  { %104 = vmatpush.msra.mxu0 %v34_v3  ;;  %198 = vmatmul.f32.vlgmr.msra.gmra.mxu1 %v1212_v7 }
   0x7   :  { %1074 = vmatpush.msra.mxu2 %v34_v3  ;;  %1075 = vmatpush.msra.mxu3 %v34_v3 }
   0x8   :  { %105 = vmatpush.msra.mxu0 %v33_v5  ;;  %835 = vmatpush.msrb.mxu1 %v173_v2 }
   0x9   :  { %1026 = vmatmul.msk.f32.vlgmr.msra.gmra.mxu0 %vm41_vm0, %v17_v6  ;;  %1076 = vmatpush.msra.mxu2 %v33_v5 }
   0xa   :  { %1077 = vmatpush.msra.mxu3 %v33_v5  ;;  %836 = vmatpush.msrb.mxu1 %v172_v4 }
   0xb   :  { %409 = vmatpush.msrb.mxu2 %v173_v2 }
   0xc   :  { %622 = vmatpush.msrb.mxu3 %v173_v2 }
   0xd   :  { %410 = vmatpush.msrb.mxu2 %v172_v4 }
   0xe   :  { %623 = vmatpush.msrb.mxu3 %v172_v4  ;;  %201 = vmatmul.f32.gmra.mxu1 %v1212_v7 }
  0x11   :  { %1027 = vmatmul.msk.f32.gmra.mxu0 %vm41_vm0, %v18_v8 }
  0x16   :  { %204 = vmatmul.f32.gmra.mxu1 %v1212_v7 }
  0x19   :  { %1028 = vmatmul.msk.f32.gmra.mxu0 %vm41_vm0, %v19_v9 }
  0x1e   :  { %207 = vmatmul.f32.gmra.mxu1 %v1212_v7 }
  0x21   :  { %1029 = vmatmul.msk.f32.gmra.mxu0 %vm41_vm0, %v20_v10 }
  0x83   :  { %v199_v14 = vpop.f32.mrf.mxu1 }
  0x86   :  { %v107_v12 = vpop.f32.mrf.mxu0 }
  0x87   :  { %v108_v13 = vadd.f32 %v1279_v11, %v107_v12 }
  0x89   :  { %156 = vst.msk [vmem:[#allocation2] sm:$0xff] %vm155_vm1, %v108_v13 }
  0x8b   :  { %v202_v19 = vpop.f32.mrf.mxu1 }
  0x8e   :  { %v110_v15 = vpop.f32.mrf.mxu0 }
  0x8f   :  { %v111_v16 = vadd.f32 %v1279_v11, %v110_v15 }
  0x90   :  { %v174_v17 = vld [vmem:[#allocation2] sm:$0xff] }
  0x91   :  { %157 = vst.msk [vmem:[#allocation2 + $0x8] sm:$0xff] %vm155_vm1, %v111_v16  ;;  %v211_v18 = vadd.f32 %v199_v14, %v174_v17 }
  0x93   :  { %1084 = vtanh.f32 %v211_v18  ;;  %v205_v25 = vpop.f32.mrf.mxu1  ;;  %v1042_v36 = vmul.f32 -1.442695, %v211_v18 }
  0x96   :  { %v113_v20 = vpop.f32.mrf.mxu0 }
  0x97   :  { %v114_v21 = vadd.f32 %v1279_v11, %v113_v20 }
  0x98   :  { %v175_v22 = vld [vmem:[#allocation2 + $0x8] sm:$0xff] }
  0x99   :  { %v1085_v23 = vpop.eup %1084  ;;  %158 = vst.msk [vmem:[#allocation2 + $0x10] sm:$0xff] %vm155_vm1, %v114_v21  ;;  %v212_v24 = vadd.f32 %v202_v19, %v175_v22 }
  0x9a   :  { %303 = vrot.lane.b32.xlu0 %v1085_v23, %s1213_s3 }
  0x9b   :  { %1086 = vtanh.f32 %v212_v24  ;;  %v208_v31 = vpop.f32.mrf.mxu1  ;;  %v1043_v37 = vmul.f32 -1.442695, %v212_v24 }
  0x9e   :  { %v116_v26 = vpop.f32.mrf.mxu0 }
  0x9f   :  { %v117_v27 = vadd.f32 %v1279_v11, %v116_v26 }
  0xa0   :  { %v176_v28 = vld [vmem:[#allocation2 + $0x10] sm:$0xff] }
  0xa1   :  { %v1087_v29 = vpop.eup %1086  ;;  %159 = vst.msk [vmem:[#allocation2 + $0x18] sm:$0xff] %vm155_vm1, %v117_v27  ;;  %v213_v30 = vadd.f32 %v205_v25, %v176_v28 }
  0xa2   :  { %305 = vrot.lane.b32.xlu0 %v1087_v29, %s1213_s3 }
  0xa3   :  { %1088 = vtanh.f32 %v213_v30  ;;  %v1044_v40 = vmul.f32 -1.442695, %v213_v30 }
  0xa8   :  { %v177_v32 = vld [vmem:[#allocation2 + $0x18] sm:$0xff] }
  0xa9   :  { %v1089_v33 = vpop.eup %1088  ;;  %v214_v34 = vadd.f32 %v208_v31, %v177_v32 }
  0xaa   :  { %307 = vrot.lane.b32.xlu1 %v1089_v33, %s1213_s3 }
  0xab   :  { %1090 = vtanh.f32 %v214_v34  ;;  %v1045_v44 = vmul.f32 -1.442695, %v214_v34 }
  0xac   :  { %1092 = vpow2.f32 %v1042_v36 }
  0xad   :  { %1094 = vpow2.f32 %v1043_v37 }
  0xb1   :  { %v1091_v35 = vpop.eup %1090 }
  0xb2   :  { %309 = vrot.lane.b32.xlu1 %v1091_v35, %s1213_s3  ;;  %v1093_v38 = vpop.eup %1092 }
  0xb3   :  { %v227_v39 = vadd.f32 1.0, %v1093_v38  ;;  %v1095_v41 = vpop.eup %1094 }
  0xb4   :  { %v228_v42 = vadd.f32 1.0, %v1095_v41 }
  0xb5   :  { %1096 = vrcp.f32 %v227_v39  ;;  %v242_v57 = vand.u32 2147483648, %v227_v39  ;;  %vm236_vm3 = vweird.f32 %v227_v39  ;;  %v240_v58 = vand.u32 2147483647, %v227_v39 }
  0xb6   :  { %1098 = vpow2.f32 %v1044_v40  ;;  %v257_v5 = vand.u32 2147483648, %v228_v42  ;;  %vm251_vm7 = vweird.f32 %v228_v42  ;;  %v255_v6 = vand.u32 2147483647, %v228_v42 }
  0xb7   :  { %1100 = vrcp.f32 %v228_v42  ;;  %v243_v62 = vor.u32 1.1754944e-38, %v242_v57  ;;  %vm241_vm5 = vcmp.eq.f32.partialorder %v240_v58, 8.507059e+37  ;;  %v27_v58 = vld [vmem:[%s1586_s0 + $0x50] sm:$0xff] }
  0xb8   :  { %1102 = vpow2.f32 %v1045_v44  ;;  %v258_v10 = vor.u32 1.1754944e-38, %v257_v5  ;;  %vm256_vm9 = vcmp.eq.f32.partialorder %v255_v6, 8.507059e+37 }
  0xbb   :  { %v1097_v43 = vpop.eup %1096 }
  0xbc   :  { %v1099_v45 = vpop.eup %1098  ;;  %v232_v46 = vmul.f32 %v1097_v43, %v227_v39  ;;  %vm237_vm2 = vweird.f32 %v1097_v43 }
  0xbd   :  { %v229_v47 = vadd.f32 1.0, %v1099_v45  ;;  %v1101_v49 = vpop.eup %1100  ;;  %vm238_vm4 = vmor %vm236_vm3, %vm237_vm2 }
  0xbe   :  { %v233_v48 = vsub.f32 1.0, %v232_v46  ;;  %v1103_v50 = vpop.eup %1102  ;;  %v247_v52 = vmul.f32 %v1101_v49, %v228_v42  ;;  %vm252_vm6 = vweird.f32 %v1101_v49 }
  0xbf   :  { %1104 = vrcp.f32 %v229_v47  ;;  %v230_v53 = vadd.f32 1.0, %v1103_v50  ;;  %vm253_vm8 = vmor %vm251_vm7, %vm252_vm6  ;;  %v272_v17 = vand.u32 2147483648, %v229_v47  ;;  %vm266_vm11 = vweird.f32 %v229_v47 }
  0xc0   :  { %v234_v51 = vmul.f32 %v1097_v43, %v233_v48  ;;  %v248_v55 = vsub.f32 1.0, %v247_v52  ;;  %v270_v18 = vand.u32 2147483647, %v229_v47 }
  0xc1   :  { %1106 = vrcp.f32 %v230_v53  ;;  %v273_v21 = vor.u32 1.1754944e-38, %v272_v17  ;;  %vm281_vm14 = vweird.f32 %v230_v53  ;;  %v287_v24 = vand.u32 2147483648, %v230_v53 }
  0xc2   :  { %v235_v54 = vadd.f32 %v1097_v43, %v234_v51  ;;  %v249_v60 = vmul.f32 %v1101_v49, %v248_v55  ;;  %vm271_vm13 = vcmp.eq.f32.partialorder %v270_v18, 8.507059e+37  ;;  %v285_v27 = vand.u32 2147483647, %v230_v53  ;;  %v26_v55 = vld [vmem:[%s1586_s0 + $0x48] sm:$0xff] }
  0xc3   :  { %v288_v28 = vor.u32 1.1754944e-38, %v287_v24 }
  0xc4   :  { %v239_v59 = vsel %vm238_vm4, %v1097_v43, %v235_v54  ;;  %v250_v2 = vadd.f32 %v1101_v49, %v249_v60  ;;  %vm286_vm3 = vcmp.eq.f32.partialorder %v285_v27, 8.507059e+37  ;;  %v21_v54 = vld [vmem:[%s1586_s0 + $0x20] sm:$0xff]  ;;  %vm178_vm4 = vcmask 130048  }
  0xc5   :  { %v1105_v56 = vpop.eup %1104  ;;  %v1293_v0 = vsel %vm241_vm5, %v243_v62, %v239_v59  ;;  %1030 = vmatmul.msk.f32.gmra.mxu0 %vm41_vm0, %v21_v54  ;;  %v28_v59 = vld [vmem:[%s1586_s0 + $0x58] sm:$0xff]  ;;  %v22_v62 = vld [vmem:[%s1586_s0 + $0x28] sm:$0xff] }
  0xc6   :  { %v262_v61 = vmul.f32 %v1105_v56, %v229_v47  ;;  %v254_v7 = vsel %vm253_vm8, %v1101_v49, %v250_v2  ;;  %vm267_vm10 = vweird.f32 %v1105_v56  ;;  %v295_v33 = vmul.f32 0.0, %v1293_v0 }
  0xc7   :  { %v1107_v4 = vpop.eup %1106  ;;  %v259_v12 = vsel %vm256_vm9, %v258_v10, %v254_v7  ;;  %vm268_vm12 = vmor %vm266_vm11, %vm267_vm10 }
  0xc8   :  { %v263_v3 = vsub.f32 1.0, %v262_v61  ;;  %v277_v9 = vmul.f32 %v1107_v4, %v230_v53  ;;  %vm282_vm15 = vweird.f32 %v1107_v4  ;;  %v296_v36 = vmul.f32 0.0, %v259_v12  ;;  %v25_v53 = vld [vmem:[%s1586_s0 + $0x40] sm:$0xff] }
  0xc9   :  { %vm283_vm2 = vmor %vm281_vm14, %vm282_vm15  ;;  %1034 = vmatmul.msk.f32.vlgmr.msra.gmra.mxu2 %vm41_vm0, %v25_v53 }
  0xca   :  { %v264_v8 = vmul.f32 %v1105_v56, %v263_v3  ;;  %v278_v16 = vsub.f32 1.0, %v277_v9 }
  0xcc   :  { %v265_v15 = vadd.f32 %v1105_v56, %v264_v8  ;;  %v279_v20 = vmul.f32 %v1107_v4, %v278_v16 }
  0xcd   :  { %1031 = vmatmul.msk.f32.gmra.mxu0 %vm41_vm0, %v22_v62 }
  0xce   :  { %v269_v19 = vsel %vm268_vm12, %v1105_v56, %v265_v15  ;;  %v280_v26 = vadd.f32 %v1107_v4, %v279_v20 }
  0xcf   :  { %v274_v23 = vsel %vm271_vm13, %v273_v21, %v269_v19 }
  0xd0   :  { %v284_v29 = vsel %vm283_vm2, %v1107_v4, %v280_v26  ;;  %v297_v41 = vmul.f32 0.0, %v274_v23 }
  0xd1   :  { %v289_v30 = vsel %vm286_vm3, %v288_v28, %v284_v29  ;;  %1035 = vmatmul.msk.f32.gmra.mxu2 %vm41_vm0, %v26_v55 }
  0xd2   :  { %v298_v44 = vmul.f32 0.0, %v289_v30 }
  0xd9   :  { %1036 = vmatmul.msk.f32.gmra.mxu2 %vm41_vm0, %v27_v58 }
  0xe1   :  { %1037 = vmatmul.msk.f32.gmra.mxu2 %vm41_vm0, %v28_v59 }
 0x10c   :  { %v304_v63 = vpop.permute.xlu0 %303 }
 0x10d   :  { %v315_v1 = vmul.f32 %v304_v63, %v1293_v0 }
 0x10f   :  { %323 = vrot.lane.b32.xlu2 %v315_v1, %s1214_s9  ;;  %v24_v1 = vld [vmem:[%s1586_s0 + $0x38] sm:$0xff] }
 0x114   :  { %v306_v13 = vpop.permute.xlu0 %305 }
 0x115   :  { %v316_v14 = vmul.f32 %v306_v13, %v259_v12 }
 0x117   :  { %325 = vrot.lane.b32.xlu2 %v316_v14, %s1214_s9 }
 0x11c   :  { %v308_v22 = vpop.permute.xlu1 %307 }
 0x11d   :  { %v317_v25 = vmul.f32 %v308_v22, %v274_v23 }
 0x11f   :  { %327 = vrot.lane.b32.xlu0 %v317_v25, %s1214_s9 }
 0x124   :  { %v310_v31 = vpop.permute.xlu1 %309 }
 0x125   :  { %v318_v32 = vmul.f32 %v310_v31, %v289_v30 }
 0x127   :  { %329 = vrot.lane.b32.xlu1 %v318_v32, %s1214_s9 }
 0x142   :  { %v119_v4 = vpop.f32.mrf.mxu0 }
 0x143   :  { %v120_v5 = vadd.f32 %v1279_v11, %v119_v4 }
 0x145   :  { %160 = vst.msk [vmem:[#allocation2 + $0x20] sm:$0xff] %vm155_vm1, %v120_v5 }
 0x14a   :  { %v122_v16 = vpop.f32.mrf.mxu0 }
 0x14b   :  { %v123_v17 = vadd.f32 %v1279_v11, %v122_v16 }
 0x14c   :  { %v131_v7 = vpop.f32.mrf.mxu2  ;;  %v383_v20 = vld [vmem:[#allocation2 + $0x20] sm:$0xff] }
 0x14d   :  { %v132_v8 = vadd.f32 %v1279_v11, %v131_v7  ;;  %161 = vst.msk [vmem:[#allocation2 + $0x28] sm:$0xff] %vm155_vm1, %v123_v17 }
 0x14f   :  { %164 = vst.msk [vmem:[#allocation2 + $0x40] sm:$0xff] %vm155_vm1, %v132_v8 }
 0x154   :  { %v134_v9 = vpop.f32.mrf.mxu2  ;;  %v384_v26 = vld [vmem:[#allocation2 + $0x28] sm:$0xff] }
 0x155   :  { %v135_v10 = vadd.f32 %v1279_v11, %v134_v9 }
 0x157   :  { %165 = vst.msk [vmem:[#allocation2 + $0x48] sm:$0xff] %vm155_vm1, %v135_v10 }
 0x169   :  { %v324_v34 = vpop.permute.xlu2 %323 }
 0x16a   :  { %v1301_v35 = vadd.f32 %v324_v34, %v295_v33 }
 0x16c   :  { %1108 = vtanh.f32 %v1301_v35 }
 0x171   :  { %v326_v37 = vpop.permute.xlu2 %325 }
 0x172   :  { %v1109_v38 = vpop.eup %1108  ;;  %v1304_v39 = vadd.f32 %v326_v37, %v296_v36 }
 0x173   :  { %347 = vrot.lane.b32.xlu2 %v1109_v38, %s1215_s10 }
 0x174   :  { %1110 = vtanh.f32 %v1304_v39 }
 0x17a   :  { %v1111_v40 = vpop.eup %1110 }
 0x17b   :  { %349 = vrot.lane.b32.xlu0 %v1111_v40, %s1215_s10 }
 0x191   :  { %v328_v42 = vpop.permute.xlu0 %327 }
 0x192   :  { %v1309_v43 = vadd.f32 %v328_v42, %v297_v41 }
 0x194   :  { %1112 = vtanh.f32 %v1309_v43 }
 0x199   :  { %v330_v45 = vpop.permute.xlu1 %329 }
 0x19a   :  { %v1113_v46 = vpop.eup %1112  ;;  %v1312_v47 = vadd.f32 %v330_v45, %v298_v44 }
 0x19b   :  { %351 = vrot.lane.b32.xlu1 %v1113_v46, %s1215_s10 }
 0x19c   :  { %1114 = vtanh.f32 %v1312_v47 }
 0x1a2   :  { %v1115_v48 = vpop.eup %1114 }
 0x1a3   :  { %353 = vrot.lane.b32.xlu2 %v1115_v48, %s1215_s10 }
 0x1cd   :  { %v348_v49 = vpop.permute.xlu2 %347 }
 0x1ce   :  { %v359_v50 = vmul.f32 %v348_v49, %v1293_v0  ;;  %v23_v0 = vld [vmem:[%s1586_s0 + $0x30] sm:$0xff] }
 0x1cf   :  { %1032 = vmatmul.msk.f32.gmra.mxu0 %vm41_vm0, %v23_v0 }
 0x1d0   :  { %367 = vrot.lane.b32.xlu0 %v359_v50, %s1216_s11 }
 0x1d7   :  { %1033 = vmatmul.msk.f32.gmra.mxu0 %vm41_vm0, %v24_v1 }
 0x1ed   :  { %v350_v51 = vpop.permute.xlu0 %349 }
 0x1ee   :  { %v360_v52 = vmul.f32 %v350_v51, %v259_v12  ;;  %v137_v12 = vpop.f32.mrf.mxu2 }
 0x1ef   :  { %v138_v13 = vadd.f32 %v1279_v11, %v137_v12 }
 0x1f0   :  { %369 = vrot.lane.b32.xlu1 %v360_v52, %s1216_s11 }
 0x1f1   :  { %166 = vst.msk [vmem:[#allocation2 + $0x50] sm:$0xff] %vm155_vm1, %v138_v13 }
 0x1f6   :  { %v140_v14 = vpop.f32.mrf.mxu2 }
 0x1f7   :  { %v141_v15 = vadd.f32 %v1279_v11, %v140_v14 }
 0x1f9   :  { %167 = vst.msk [vmem:[#allocation2 + $0x58] sm:$0xff] %vm155_vm1, %v141_v15 }
 0x1fd   :  { %v354_v56 = vpop.permute.xlu2 %353 }
 0x1fe   :  { %v362_v57 = vmul.f32 %v354_v56, %v289_v30 }
 0x200   :  { %373 = vrot.lane.b32.xlu0 %v362_v57, %s1216_s11 }
 0x20d   :  { %v352_v60 = vpop.permute.xlu1 %351 }
 0x20e   :  { %v361_v61 = vmul.f32 %v352_v60, %v274_v23 }
 0x210   :  { %371 = vrot.lane.b32.xlu2 %v361_v61, %s1216_s11 }
 0x242   :  { %v368_v63 = vpop.permute.xlu0 %367 }
 0x243   :  { %379 = vst.msk [vmem:[%s1588_s4] sm:$0xff] %vm178_vm4, %v368_v63  ;;  %1046 = vmatmul.msk.f32.vlgmr.msrb.gmra.mxu2 %vm178_vm4, %v368_v63 }
 0x24c   :  { %v125_v18 = vpop.f32.mrf.mxu0 }
 0x24d   :  { %v126_v19 = vadd.f32 %v1279_v11, %v125_v18 }
 0x24f   :  { %162 = vst.msk [vmem:[#allocation2 + $0x30] sm:$0xff] %vm155_vm1, %v126_v19 }
 0x254   :  { %v128_v23 = vpop.f32.mrf.mxu0 }
 0x255   :  { %v129_v24 = vadd.f32 %v1279_v11, %v128_v23 }
 0x256   :  { %v385_v29 = vld [vmem:[#allocation2 + $0x30] sm:$0xff] }
 0x257   :  { %163 = vst.msk [vmem:[#allocation2 + $0x38] sm:$0xff] %vm155_vm1, %v129_v24 }
 0x25e   :  { %v386_v33 = vld [vmem:[#allocation2 + $0x38] sm:$0xff] }
 0x262   :  { %v370_v2 = vpop.permute.xlu1 %369 }
 0x263   :  { %380 = vst.msk [vmem:[%s1588_s4 + $0x8] sm:$0xff] %vm178_vm4, %v370_v2  ;;  %1047 = vmatmul.msk.f32.gmra.mxu2 %vm178_vm4, %v370_v2 }
 0x26a   :  { %v372_v3 = vpop.permute.xlu2 %371 }
 0x26b   :  { %381 = vst.msk [vmem:[%s1588_s4 + $0x10] sm:$0xff] %vm178_vm4, %v372_v3  ;;  %1048 = vmatmul.msk.f32.gmra.mxu2 %vm178_vm4, %v372_v3 }
 0x272   :  { %v374_v6 = vpop.permute.xlu0 %373 }
 0x273   :  { %382 = vst.msk [vmem:[%s1588_s4 + $0x18] sm:$0xff] %vm178_vm4, %v374_v6  ;;  %1049 = vmatmul.msk.f32.gmra.mxu2 %vm178_vm4, %v374_v6 }
 0x2c6   :  { %v412_v21 = vpop.f32.mrf.mxu2 }
 0x2c7   :  { %v424_v22 = vadd.f32 %v412_v21, %v383_v20 }
 0x2c9   :  { %1116 = vtanh.f32 %v424_v22  ;;  %v1050_v40 = vmul.f32 -1.442695, %v424_v22 }
 0x2cf   :  { %v1117_v25 = vpop.eup %1116 }
 0x2d0   :  { %516 = vrot.lane.b32.xlu1 %v1117_v25, %s1213_s3 }
 0x2e6   :  { %v415_v27 = vpop.f32.mrf.mxu2 }
 0x2e7   :  { %v425_v28 = vadd.f32 %v415_v27, %v384_v26 }
 0x2e9   :  { %1118 = vtanh.f32 %v425_v28  ;;  %v1051_v41 = vmul.f32 -1.442695, %v425_v28 }
 0x2ee   :  { %v418_v30 = vpop.f32.mrf.mxu2 }
 0x2ef   :  { %v1119_v31 = vpop.eup %1118  ;;  %v426_v32 = vadd.f32 %v418_v30, %v385_v29 }
 0x2f0   :  { %518 = vrot.lane.b32.xlu2 %v1119_v31, %s1213_s3 }
 0x2f1   :  { %1120 = vtanh.f32 %v426_v32  ;;  %v1052_v57 = vmul.f32 -1.442695, %v426_v32 }
 0x2f6   :  { %v421_v34 = vpop.f32.mrf.mxu2 }
 0x2f7   :  { %v1121_v36 = vpop.eup %1120  ;;  %v427_v37 = vadd.f32 %v421_v34, %v386_v33 }
 0x2f8   :  { %520 = vrot.lane.b32.xlu0 %v1121_v36, %s1213_s3 }
 0x2f9   :  { %1122 = vtanh.f32 %v427_v37  ;;  %v1053_v3 = vmul.f32 -1.442695, %v427_v37 }
 0x2fa   :  { %1124 = vpow2.f32 %v1050_v40 }
 0x2fb   :  { %1126 = vpow2.f32 %v1051_v41 }
 0x2ff   :  { %v1123_v38 = vpop.eup %1122 }
 0x300   :  { %522 = vrot.lane.b32.xlu1 %v1123_v38, %s1213_s3  ;;  %v1125_v42 = vpop.eup %1124 }
 0x301   :  { %v440_v44 = vadd.f32 1.0, %v1125_v42  ;;  %v1127_v45 = vpop.eup %1126 }
 0x302   :  { %v441_v46 = vadd.f32 1.0, %v1127_v45 }
 0x303   :  { %1128 = vrcp.f32 %v440_v44  ;;  %v455_v56 = vand.u32 2147483648, %v440_v44  ;;  %vm449_vm6 = vweird.f32 %v440_v44  ;;  %v453_v58 = vand.u32 2147483647, %v440_v44 }
 0x304   :  { %1130 = vrcp.f32 %v441_v46  ;;  %v470_v2 = vand.u32 2147483648, %v441_v46  ;;  %vm464_vm10 = vweird.f32 %v441_v46  ;;  %v468_v4 = vand.u32 2147483647, %v441_v46 }
 0x305   :  { %v456_v61 = vor.u32 1.1754944e-38, %v455_v56  ;;  %1132 = vpow2.f32 %v1052_v57  ;;  %vm454_vm8 = vcmp.eq.f32.partialorder %v453_v58, 8.507059e+37  ;;  %v29_v58 = vld [vmem:[%s1586_s0 + $0x60] sm:$0xff] }
 0x306   :  { %v471_v7 = vor.u32 1.1754944e-38, %v470_v2  ;;  %1134 = vpow2.f32 %v1053_v3  ;;  %vm469_vm12 = vcmp.eq.f32.partialorder %v468_v4, 8.507059e+37  ;;  %1038 = vmatmul.msk.f32.vlgmr.msra.gmra.mxu3 %vm41_vm0, %v29_v58 }
 0x309   :  { %v1129_v48 = vpop.eup %1128 }
 0x30a   :  { %v445_v49 = vmul.f32 %v1129_v48, %v440_v44  ;;  %v1131_v51 = vpop.eup %1130  ;;  %vm450_vm5 = vweird.f32 %v1129_v48 }
 0x30b   :  { %v460_v53 = vmul.f32 %v1131_v51, %v441_v46  ;;  %vm451_vm7 = vmor %vm449_vm6, %vm450_vm5  ;;  %vm465_vm9 = vweird.f32 %v1131_v51  ;;  %v1133_v5 = vpop.eup %1132 }
 0x30c   :  { %v446_v50 = vsub.f32 1.0, %v445_v49  ;;  %vm466_vm11 = vmor %vm464_vm10, %vm465_vm9  ;;  %v442_v8 = vadd.f32 1.0, %v1133_v5  ;;  %v1135_v13 = vpop.eup %1134 }
 0x30d   :  { %v461_v55 = vsub.f32 1.0, %v460_v53  ;;  %v443_v14 = vadd.f32 1.0, %v1135_v13 }
 0x30e   :  { %v447_v52 = vmul.f32 %v1129_v48, %v446_v50  ;;  %1136 = vrcp.f32 %v442_v8  ;;  %v485_v23 = vand.u32 2147483648, %v442_v8  ;;  %vm479_vm14 = vweird.f32 %v442_v8 }
 0x30f   :  { %v462_v60 = vmul.f32 %v1131_v51, %v461_v55  ;;  %1138 = vrcp.f32 %v443_v14  ;;  %v483_v24 = vand.u32 2147483647, %v442_v8  ;;  %v500_v32 = vand.u32 2147483648, %v443_v14 }
 0x310   :  { %v448_v54 = vadd.f32 %v1129_v48, %v447_v52  ;;  %v486_v27 = vor.u32 1.1754944e-38, %v485_v23  ;;  %vm494_vm5 = vweird.f32 %v443_v14  ;;  %v498_v33 = vand.u32 2147483647, %v443_v14 }
 0x311   :  { %v463_v1 = vadd.f32 %v1131_v51, %v462_v60  ;;  %vm484_vm2 = vcmp.eq.f32.partialorder %v483_v24, 8.507059e+37  ;;  %v501_v36 = vor.u32 1.1754944e-38, %v500_v32  ;;  %v598_v24 = vld [vmem:[#allocation2 + $0x50] sm:$0xff] }
 0x312   :  { %v452_v59 = vsel %vm451_vm7, %v1129_v48, %v448_v54  ;;  %vm499_vm7 = vcmp.eq.f32.partialorder %v498_v33, 8.507059e+37 }
 0x313   :  { %v1394_v63 = vsel %vm454_vm8, %v456_v61, %v452_v59  ;;  %v467_v6 = vsel %vm466_vm11, %v1131_v51, %v463_v1  ;;  %v31_v61 = vld [vmem:[%s1586_s0 + $0x70] sm:$0xff] }
 0x314   :  { %v1398_v9 = vsel %vm469_vm12, %v471_v7, %v467_v6  ;;  %v1137_v15 = vpop.eup %1136  ;;  %v508_v41 = vmul.f32 %v1394_v63, %v1301_v35 }
 0x315   :  { %v475_v16 = vmul.f32 %v1137_v15, %v442_v8  ;;  %v1139_v18 = vpop.eup %1138  ;;  %vm480_vm13 = vweird.f32 %v1137_v15  ;;  %v509_v46 = vmul.f32 %v1398_v9, %v1304_v39 }
 0x316   :  { %v490_v20 = vmul.f32 %v1139_v18, %v443_v14  ;;  %vm481_vm15 = vmor %vm479_vm14, %vm480_vm13  ;;  %vm495_vm3 = vweird.f32 %v1139_v18 }
 0x317   :  { %v476_v17 = vsub.f32 1.0, %v475_v16  ;;  %vm496_vm6 = vmor %vm494_vm5, %vm495_vm3  ;;  %v596_v16 = vld [vmem:[#allocation2 + $0x40] sm:$0xff] }
 0x318   :  { %v491_v22 = vsub.f32 1.0, %v490_v20 }
 0x319   :  { %v477_v19 = vmul.f32 %v1137_v15, %v476_v17 }
 0x31a   :  { %v492_v26 = vmul.f32 %v1139_v18, %v491_v22 }
 0x31b   :  { %v478_v21 = vadd.f32 %v1137_v15, %v477_v19  ;;  %v597_v19 = vld [vmem:[#allocation2 + $0x48] sm:$0xff] }
 0x31c   :  { %v493_v31 = vadd.f32 %v1139_v18, %v492_v26 }
 0x31d   :  { %v482_v25 = vsel %vm481_vm15, %v1137_v15, %v478_v21 }
 0x31e   :  { %v487_v29 = vsel %vm484_vm2, %v486_v27, %v482_v25  ;;  %v497_v34 = vsel %vm496_vm6, %v1139_v18, %v493_v31 }
 0x31f   :  { %v502_v38 = vsel %vm499_vm7, %v501_v36, %v497_v34  ;;  %v510_v39 = vmul.f32 %v487_v29, %v1309_v43  ;;  %v30_v43 = vld [vmem:[%s1586_s0 + $0x68] sm:$0xff] }
 0x320   :  { %v511_v35 = vmul.f32 %v502_v38, %v1312_v47  ;;  %1039 = vmatmul.msk.f32.gmra.mxu3 %vm41_vm0, %v30_v43 }
 0x328   :  { %1040 = vmatmul.msk.f32.gmra.mxu3 %vm41_vm0, %v31_v61 }
 0x342   :  { %v517_v62 = vpop.permute.xlu1 %516 }
 0x343   :  { %v528_v0 = vmul.f32 %v517_v62, %v1394_v63 }
 0x345   :  { %536 = vrot.lane.b32.xlu2 %v528_v0, %s1214_s9  ;;  %v32_v0 = vld [vmem:[%s1586_s0 + $0x78] sm:$0xff] }
 0x346   :  { %1041 = vmatmul.msk.f32.gmra.mxu3 %vm41_vm0, %v32_v0 }
 0x34a   :  { %v519_v10 = vpop.permute.xlu2 %518 }
 0x34b   :  { %v529_v12 = vmul.f32 %v519_v10, %v1398_v9 }
 0x34d   :  { %538 = vrot.lane.b32.xlu0 %v529_v12, %s1214_s9 }
 0x36a   :  { %v521_v28 = vpop.permute.xlu0 %520 }
 0x36b   :  { %v530_v30 = vmul.f32 %v521_v28, %v487_v29 }
 0x36d   :  { %540 = vrot.lane.b32.xlu1 %v530_v30, %s1214_s9 }
 0x372   :  { %v523_v37 = vpop.permute.xlu1 %522 }
 0x373   :  { %v531_v40 = vmul.f32 %v523_v37, %v502_v38 }
 0x375   :  { %542 = vrot.lane.b32.xlu2 %v531_v40, %s1214_s9 }
 0x389   :  { %v143_v5 = vpop.f32.mrf.mxu3 }
 0x38a   :  { %v144_v6 = vadd.f32 %v1279_v11, %v143_v5 }
 0x38c   :  { %168 = vst.msk [vmem:[#allocation2 + $0x60] sm:$0xff] %vm155_vm1, %v144_v6 }
 0x39f   :  { %v537_v42 = vpop.permute.xlu2 %536 }
 0x3a0   :  { %v1406_v44 = vadd.f32 %v537_v42, %v508_v41 }
 0x3a2   :  { %1140 = vtanh.f32 %v1406_v44 }
 0x3a3   :  { %v146_v8 = vpop.f32.mrf.mxu3 }
 0x3a8   :  { %v1141_v45 = vpop.eup %1140 }
 0x3a9   :  { %560 = vrot.lane.b32.xlu0 %v1141_v45, %s1215_s10 }
 0x3ab   :  { %v149_v12 = vpop.f32.mrf.mxu3 }
 0x3ac   :  { %v150_v13 = vadd.f32 %v1279_v11, %v149_v12 }
 0x3ae   :  { %170 = vst.msk [vmem:[#allocation2 + $0x70] sm:$0xff] %vm155_vm1, %v150_v13 }
 0x3bf   :  { %v539_v48 = vpop.permute.xlu0 %538 }
 0x3c0   :  { %v1412_v49 = vadd.f32 %v539_v48, %v509_v46 }
 0x3c2   :  { %1142 = vtanh.f32 %v1412_v49 }
 0x3c8   :  { %v1143_v50 = vpop.eup %1142 }
 0x3c9   :  { %562 = vrot.lane.b32.xlu1 %v1143_v50, %s1215_s10  ;;  %v152_v14 = vpop.f32.mrf.mxu3 }
 0x3ca   :  { %v153_v15 = vadd.f32 %v1279_v11, %v152_v14 }
 0x3cc   :  { %171 = vst.msk [vmem:[#allocation2 + $0x78] sm:$0xff] %vm155_vm1, %v153_v15 }
 0x3cf   :  { %v543_v51 = vpop.permute.xlu2 %542 }
 0x3d0   :  { %v1417_v52 = vadd.f32 %v543_v51, %v511_v35 }
 0x3d2   :  { %1144 = vtanh.f32 %v1417_v52 }
 0x3d8   :  { %v1145_v53 = vpop.eup %1144 }
 0x3d9   :  { %566 = vrot.lane.b32.xlu0 %v1145_v53, %s1215_s10 }
 0x3df   :  { %v541_v54 = vpop.permute.xlu1 %540 }
 0x3e0   :  { %v1422_v55 = vadd.f32 %v541_v54, %v510_v39 }
 0x3e2   :  { %1146 = vtanh.f32 %v1422_v55 }
 0x3e8   :  { %v1147_v56 = vpop.eup %1146 }
 0x3e9   :  { %564 = vrot.lane.b32.xlu2 %v1147_v56, %s1215_s10 }
 0x41b   :  { %v561_v57 = vpop.permute.xlu0 %560 }
 0x41c   :  { %v572_v47 = vmul.f32 %v561_v57, %v1394_v63 }
 0x41e   :  { %580 = vrot.lane.b32.xlu1 %v572_v47, %s1216_s11 }
 0x43b   :  { %v563_v59 = vpop.permute.xlu1 %562 }
 0x43c   :  { %v573_v60 = vmul.f32 %v563_v59, %v1398_v9  ;;  %v147_v9 = vadd.f32 %v1279_v11, %v146_v8  ;;  %v599_v11 = vld [vmem:[#allocation2 + $0x58] sm:$0xff] }
 0x43e   :  { %582 = vrot.lane.b32.xlu2 %v573_v60, %s1216_s11  ;;  %169 = vst.msk [vmem:[#allocation2 + $0x68] sm:$0xff] %vm155_vm1, %v147_v9 }
 0x443   :  { %v565_v62 = vpop.permute.xlu2 %564 }
 0x444   :  { %v574_v63 = vmul.f32 %v565_v62, %v487_v29 }
 0x446   :  { %584 = vrot.lane.b32.xlu0 %v574_v63, %s1216_s11 }
 0x44b   :  { %v567_v1 = vpop.permute.xlu0 %566 }
 0x44c   :  { %v575_v2 = vmul.f32 %v567_v1, %v502_v38 }
 0x44e   :  { %586 = vrot.lane.b32.xlu1 %v575_v2, %s1216_s11 }
 0x490   :  { %v581_v3 = vpop.permute.xlu1 %580 }
 0x491   :  { %592 = vst.msk [vmem:[%s1588_s4 + $0x20] sm:$0xff] %vm178_vm4, %v581_v3  ;;  %1054 = vmatmul.msk.f32.vlgmr.msrb.gmra.mxu3 %vm178_vm4, %v581_v3 }
 0x498   :  { %v583_v4 = vpop.permute.xlu2 %582 }
 0x499   :  { %593 = vst.msk [vmem:[%s1588_s4 + $0x28] sm:$0xff] %vm178_vm4, %v583_v4  ;;  %1055 = vmatmul.msk.f32.gmra.mxu3 %vm178_vm4, %v583_v4 }
 0x4b8   :  { %v585_v7 = vpop.permute.xlu0 %584 }
 0x4b9   :  { %594 = vst.msk [vmem:[%s1588_s4 + $0x30] sm:$0xff] %vm178_vm4, %v585_v7  ;;  %1056 = vmatmul.msk.f32.gmra.mxu3 %vm178_vm4, %v585_v7 }
 0x4c0   :  { %v587_v10 = vpop.permute.xlu1 %586 }
 0x4c1   :  { %595 = vst.msk [vmem:[%s1588_s4 + $0x38] sm:$0xff] %vm178_vm4, %v587_v10  ;;  %1057 = vmatmul.msk.f32.gmra.mxu3 %vm178_vm4, %v587_v10 }
 0x514   :  { %v625_v17 = vpop.f32.mrf.mxu3 }
 0x515   :  { %v637_v18 = vadd.f32 %v625_v17, %v596_v16 }
 0x517   :  { %1148 = vtanh.f32 %v637_v18  ;;  %v1058_v30 = vmul.f32 -1.442695, %v637_v18 }
 0x51c   :  { %v628_v20 = vpop.f32.mrf.mxu3 }
 0x51d   :  { %v1149_v21 = vpop.eup %1148  ;;  %v638_v22 = vadd.f32 %v628_v20, %v597_v19 }
 0x51e   :  { %729 = vrot.lane.b32.xlu2 %v1149_v21, %s1213_s3 }
 0x51f   :  { %1150 = vtanh.f32 %v638_v22  ;;  %v1059_v38 = vmul.f32 -1.442695, %v638_v22 }
 0x525   :  { %v1151_v23 = vpop.eup %1150 }
 0x526   :  { %731 = vrot.lane.b32.xlu0 %v1151_v23, %s1213_s3 }
 0x53c   :  { %v631_v25 = vpop.f32.mrf.mxu3 }
 0x53d   :  { %v639_v26 = vadd.f32 %v631_v25, %v598_v24 }
 0x53f   :  { %1152 = vtanh.f32 %v639_v26  ;;  %v1060_v59 = vmul.f32 -1.442695, %v639_v26 }
 0x544   :  { %v634_v27 = vpop.f32.mrf.mxu3 }
 0x545   :  { %v1153_v28 = vpop.eup %1152  ;;  %v640_v29 = vadd.f32 %v634_v27, %v599_v11 }
 0x546   :  { %733 = vrot.lane.b32.xlu1 %v1153_v28, %s1213_s3 }
 0x547   :  { %1154 = vtanh.f32 %v640_v29  ;;  %v1061_v54 = vmul.f32 -1.442695, %v640_v29 }
 0x548   :  { %1156 = vpow2.f32 %v1058_v30 }
 0x54d   :  { %v1155_v31 = vpop.eup %1154 }
 0x54e   :  { %735 = vrot.lane.b32.xlu2 %v1155_v31, %s1213_s3  ;;  %v1157_v32 = vpop.eup %1156 }
 0x54f   :  { %v653_v33 = vadd.f32 1.0, %v1157_v32 }
 0x551   :  { %1158 = vrcp.f32 %v653_v33  ;;  %v668_v42 = vand.u32 2147483648, %v653_v33  ;;  %vm662_vm1 = vweird.f32 %v653_v33  ;;  %v666_v45 = vand.u32 2147483647, %v653_v33 }
 0x552   :  { %1160 = vpow2.f32 %v1059_v38 }
 0x553   :  { %v669_v50 = vor.u32 1.1754944e-38, %v668_v42  ;;  %vm667_vm9 = vcmp.eq.f32.partialorder %v666_v45, 8.507059e+37 }
 0x557   :  { %v1159_v34 = vpop.eup %1158 }
 0x558   :  { %v658_v36 = vmul.f32 %v1159_v34, %v653_v33  ;;  %vm663_vm0 = vweird.f32 %v1159_v34  ;;  %v1161_v46 = vpop.eup %1160 }
 0x559   :  { %vm664_vm8 = vmor %vm662_vm1, %vm663_vm0  ;;  %v654_v35 = vadd.f32 1.0, %v1161_v46 }
 0x55a   :  { %v659_v37 = vsub.f32 1.0, %v658_v36 }
 0x55b   :  { %1162 = vrcp.f32 %v654_v35  ;;  %v683_v63 = vand.u32 2147483648, %v654_v35  ;;  %vm677_vm11 = vweird.f32 %v654_v35  ;;  %v681_v0 = vand.u32 2147483647, %v654_v35 }
 0x55c   :  { %v660_v40 = vmul.f32 %v1159_v34, %v659_v37  ;;  %1164 = vpow2.f32 %v1061_v54 }
 0x55d   :  { %v684_v4 = vor.u32 1.1754944e-38, %v683_v63  ;;  %vm682_vm13 = vcmp.eq.f32.partialorder %v681_v0, 8.507059e+37  ;;  %v810_v63 = vld [vmem:[#allocation2 + $0x68] sm:$0xff] }
 0x55e   :  { %v661_v41 = vadd.f32 %v1159_v34, %v660_v40 }
 0x560   :  { %v665_v48 = vsel %vm664_vm8, %v1159_v34, %v661_v41 }
 0x561   :  { %v1480_v51 = vsel %vm667_vm9, %v669_v50, %v665_v48  ;;  %v1163_v56 = vpop.eup %1162 }
 0x562   :  { %v1165_v57 = vpop.eup %1164  ;;  %v673_v47 = vmul.f32 %v1163_v56, %v654_v35  ;;  %vm678_vm10 = vweird.f32 %v1163_v56  ;;  %v721_v31 = vmul.f32 %v1480_v51, %v1406_v44 }
 0x563   :  { %v656_v58 = vadd.f32 1.0, %v1165_v57  ;;  %vm679_vm12 = vmor %vm677_vm11, %vm678_vm10 }
 0x564   :  { %v674_v43 = vsub.f32 1.0, %v673_v47 }
 0x565   :  { %1166 = vrcp.f32 %v656_v58  ;;  %v713_v14 = vand.u32 2147483648, %v656_v58  ;;  %vm707_vm15 = vweird.f32 %v656_v58  ;;  %v711_v15 = vand.u32 2147483647, %v656_v58 }
 0x566   :  { %v675_v60 = vmul.f32 %v1163_v56, %v674_v43  ;;  %1168 = vpow2.f32 %v1060_v59  ;;  %v809_v59 = vld [vmem:[#allocation2 + $0x60] sm:$0xff] }
 0x567   :  { %v714_v18 = vor.u32 1.1754944e-38, %v713_v14  ;;  %vm712_vm3 = vcmp.eq.f32.partialorder %v711_v15, 8.507059e+37 }
 0x568   :  { %v676_v61 = vadd.f32 %v1163_v56, %v675_v60 }
 0x56a   :  { %v680_v2 = vsel %vm679_vm12, %v1163_v56, %v676_v61 }
 0x56b   :  { %v1167_v62 = vpop.eup %1166  ;;  %v1484_v7 = vsel %vm682_vm13, %v684_v4, %v680_v2 }
 0x56c   :  { %v1169_v1 = vpop.eup %1168  ;;  %v703_v3 = vmul.f32 %v1167_v62, %v656_v58  ;;  %vm708_vm14 = vweird.f32 %v1167_v62  ;;  %v722_v36 = vmul.f32 %v1484_v7, %v1412_v49 }
 0x56d   :  { %v655_v5 = vadd.f32 1.0, %v1169_v1  ;;  %vm709_vm2 = vmor %vm707_vm15, %vm708_vm14 }
 0x56e   :  { %v704_v9 = vsub.f32 1.0, %v703_v3  ;;  %v811_v3 = vld [vmem:[#allocation2 + $0x70] sm:$0xff] }
 0x56f   :  { %1170 = vrcp.f32 %v655_v5  ;;  %v698_v25 = vand.u32 2147483648, %v655_v5  ;;  %vm692_vm6 = vweird.f32 %v655_v5  ;;  %v696_v26 = vand.u32 2147483647, %v655_v5 }
 0x570   :  { %v705_v10 = vmul.f32 %v1167_v62, %v704_v9 }
 0x571   :  { %v699_v27 = vor.u32 1.1754944e-38, %v698_v25  ;;  %vm697_vm0 = vcmp.eq.f32.partialorder %v696_v26, 8.507059e+37 }
 0x572   :  { %v706_v12 = vadd.f32 %v1167_v62, %v705_v10 }
 0x574   :  { %v710_v16 = vsel %vm709_vm2, %v1167_v62, %v706_v12 }
 0x575   :  { %v1171_v13 = vpop.eup %1170  ;;  %v715_v19 = vsel %vm712_vm3, %v714_v18, %v710_v16 }
 0x576   :  { %v688_v17 = vmul.f32 %v1171_v13, %v655_v5  ;;  %vm693_vm5 = vweird.f32 %v1171_v13  ;;  %v724_v45 = vmul.f32 %v715_v19, %v1417_v52 }
 0x577   :  { %vm694_vm7 = vmor %vm692_vm6, %vm693_vm5 }
 0x578   :  { %v730_v53 = vpop.permute.xlu2 %729  ;;  %v689_v22 = vsub.f32 1.0, %v688_v17 }
 0x579   :  { %v741_v39 = vmul.f32 %v730_v53, %v1480_v51 }
 0x57a   :  { %v690_v23 = vmul.f32 %v1171_v13, %v689_v22 }
 0x57b   :  { %749 = vrot.lane.b32.xlu0 %v741_v39, %s1214_s9 }
 0x57c   :  { %v691_v24 = vadd.f32 %v1171_v13, %v690_v23 }
 0x57e   :  { %v695_v11 = vsel %vm694_vm7, %v1171_v13, %v691_v24 }
 0x57f   :  { %v700_v29 = vsel %vm697_vm0, %v699_v27, %v695_v11 }
 0x580   :  { %v723_v40 = vmul.f32 %v700_v29, %v1422_v55 }
 0x598   :  { %v732_v6 = vpop.permute.xlu0 %731 }
 0x599   :  { %v742_v8 = vmul.f32 %v732_v6, %v1484_v7  ;;  %v812_v6 = vld [vmem:[#allocation2 + $0x78] sm:$0xff] }
 0x59b   :  { %751 = vrot.lane.b32.xlu1 %v742_v8, %s1214_s9 }
 0x5a8   :  { %v736_v20 = vpop.permute.xlu2 %735 }
 0x5a9   :  { %v744_v21 = vmul.f32 %v736_v20, %v715_v19 }
 0x5ab   :  { %755 = vrot.lane.b32.xlu0 %v744_v21, %s1214_s9 }
 0x5b8   :  { %v734_v28 = vpop.permute.xlu1 %733 }
 0x5b9   :  { %v743_v30 = vmul.f32 %v734_v28, %v700_v29 }
 0x5bb   :  { %753 = vrot.lane.b32.xlu2 %v743_v30, %s1214_s9 }
 0x5ed   :  { %v750_v32 = vpop.permute.xlu0 %749 }
 0x5ee   :  { %v1492_v33 = vadd.f32 %v750_v32, %v721_v31 }
 0x5f0   :  { %1172 = vtanh.f32 %v1492_v33 }
 0x5f6   :  { %v1173_v34 = vpop.eup %1172 }
 0x5f7   :  { %773 = vrot.lane.b32.xlu1 %v1173_v34, %s1215_s10 }
 0x60d   :  { %v752_v37 = vpop.permute.xlu1 %751 }
 0x60e   :  { %v1498_v38 = vadd.f32 %v752_v37, %v722_v36 }
 0x610   :  { %1174 = vtanh.f32 %v1498_v38 }
 0x615   :  { %v754_v41 = vpop.permute.xlu2 %753 }
 0x616   :  { %v1175_v44 = vpop.eup %1174  ;;  %v1502_v42 = vadd.f32 %v754_v41, %v723_v40 }
 0x617   :  { %775 = vrot.lane.b32.xlu2 %v1175_v44, %s1215_s10 }
 0x618   :  { %1176 = vtanh.f32 %v1502_v42 }
 0x61d   :  { %v756_v46 = vpop.permute.xlu0 %755 }
 0x61e   :  { %v1177_v48 = vpop.eup %1176  ;;  %v1507_v49 = vadd.f32 %v756_v46, %v724_v45 }
 0x61f   :  { %777 = vrot.lane.b32.xlu0 %v1177_v48, %s1215_s10 }
 0x620   :  { %1178 = vtanh.f32 %v1507_v49 }
 0x626   :  { %v1179_v50 = vpop.eup %1178 }
 0x627   :  { %779 = vrot.lane.b32.xlu1 %v1179_v50, %s1215_s10 }
 0x669   :  { %v774_v55 = vpop.permute.xlu1 %773 }
 0x66a   :  { %v785_v35 = vmul.f32 %v774_v55, %v1480_v51 }
 0x66c   :  { %793 = vrot.lane.b32.xlu2 %v785_v35, %s1216_s11 }
 0x671   :  { %v776_v53 = vpop.permute.xlu2 %775 }
 0x672   :  { %v786_v39 = vmul.f32 %v776_v53, %v1484_v7 }
 0x674   :  { %795 = vrot.lane.b32.xlu0 %v786_v39, %s1216_s11 }
 0x691   :  { %v778_v52 = vpop.permute.xlu0 %777 }
 0x692   :  { %v787_v54 = vmul.f32 %v778_v52, %v700_v29 }
 0x694   :  { %797 = vrot.lane.b32.xlu1 %v787_v54, %s1216_s11 }
 0x699   :  { %v780_v56 = vpop.permute.xlu1 %779 }
 0x69a   :  { %v788_v57 = vmul.f32 %v780_v56, %v715_v19 }
 0x69c   :  { %799 = vrot.lane.b32.xlu2 %v788_v57, %s1216_s11 }
 0x6c6   :  { %v794_v47 = vpop.permute.xlu2 %793 }
 0x6c7   :  { %805 = vst.msk [vmem:[%s1588_s4 + $0x40] sm:$0xff] %vm178_vm4, %v794_v47  ;;  %1062 = vmatmul.msk.f32.vlgmr.msrb.gmra.mxu1 %vm178_vm4, %v794_v47 }
 0x6e6   :  { %v796_v51 = vpop.permute.xlu0 %795 }
 0x6e7   :  { %806 = vst.msk [vmem:[%s1588_s4 + $0x48] sm:$0xff] %vm178_vm4, %v796_v51  ;;  %1063 = vmatmul.msk.f32.gmra.mxu1 %vm178_vm4, %v796_v51 }
 0x6f6   :  { %v800_v58 = vpop.permute.xlu2 %799 }
 0x6f7   :  { %808 = vst.msk [vmem:[%s1588_s4 + $0x58] sm:$0xff] %vm178_vm4, %v800_v58 }
 0x706   :  { %v798_v43 = vpop.permute.xlu1 %797 }
 0x707   :  { %807 = vst.msk [vmem:[%s1588_s4 + $0x50] sm:$0xff] %vm178_vm4, %v798_v43  ;;  %1064 = vmatmul.msk.f32.gmra.mxu1 %vm178_vm4, %v798_v43 }
 0x70f   :  { %1065 = vmatmul.msk.f32.gmra.mxu1 %vm178_vm4, %v800_v58 }
 0x744   :  { %v838_v60 = vpop.f32.mrf.mxu1 }
 0x745   :  { %v850_v61 = vadd.f32 %v838_v60, %v809_v59 }
 0x747   :  { %1180 = vtanh.f32 %v850_v61  ;;  %v1066_v10 = vmul.f32 -1.442695, %v850_v61 }
 0x74d   :  { %v1181_v62 = vpop.eup %1180 }
 0x74e   :  { %942 = vrot.lane.b32.xlu0 %v1181_v62, %s1213_s3 }
 0x764   :  { %v841_v0 = vpop.f32.mrf.mxu1 }
 0x765   :  { %v851_v1 = vadd.f32 %v841_v0, %v810_v63 }
 0x767   :  { %1182 = vtanh.f32 %v851_v1  ;;  %v1067_v18 = vmul.f32 -1.442695, %v851_v1 }
 0x76d   :  { %v1183_v2 = vpop.eup %1182 }
 0x76e   :  { %944 = vrot.lane.b32.xlu1 %v1183_v2, %s1213_s3 }
 0x784   :  { %v844_v4 = vpop.f32.mrf.mxu1 }
 0x785   :  { %v852_v5 = vadd.f32 %v844_v4, %v811_v3 }
 0x787   :  { %1184 = vtanh.f32 %v852_v5  ;;  %v1068_v22 = vmul.f32 -1.442695, %v852_v5 }
 0x78c   :  { %v847_v7 = vpop.f32.mrf.mxu1 }
 0x78d   :  { %v1185_v8 = vpop.eup %1184  ;;  %v853_v9 = vadd.f32 %v847_v7, %v812_v6 }
 0x78e   :  { %946 = vrot.lane.b32.xlu2 %v1185_v8, %s1213_s3 }
 0x78f   :  { %1186 = vtanh.f32 %v853_v9  ;;  %v1069_v48 = vmul.f32 -1.442695, %v853_v9 }
 0x790   :  { %1188 = vpow2.f32 %v1066_v10 }
 0x795   :  { %v1187_v12 = vpop.eup %1186 }
 0x796   :  { %948 = vrot.lane.b32.xlu0 %v1187_v12, %s1213_s3  ;;  %v1189_v13 = vpop.eup %1188 }
 0x797   :  { %v866_v14 = vadd.f32 1.0, %v1189_v13 }
 0x799   :  { %1190 = vrcp.f32 %v866_v14  ;;  %v881_v21 = vand.u32 2147483648, %v866_v14  ;;  %vm875_vm8 = vweird.f32 %v866_v14  ;;  %v879_v23 = vand.u32 2147483647, %v866_v14 }
 0x79a   :  { %1192 = vpow2.f32 %v1067_v18 }
 0x79b   :  { %v882_v26 = vor.u32 1.1754944e-38, %v881_v21  ;;  %1194 = vpow2.f32 %v1068_v22  ;;  %vm880_vm10 = vcmp.eq.f32.partialorder %v879_v23, 8.507059e+37 }
 0x79f   :  { %v1191_v15 = vpop.eup %1190 }
 0x7a0   :  { %v871_v16 = vmul.f32 %v1191_v15, %v866_v14  ;;  %vm876_vm1 = vweird.f32 %v1191_v15  ;;  %v1193_v24 = vpop.eup %1192 }
 0x7a1   :  { %vm877_vm9 = vmor %vm875_vm8, %vm876_vm1  ;;  %v867_v11 = vadd.f32 1.0, %v1193_v24  ;;  %v1195_v30 = vpop.eup %1194 }
 0x7a2   :  { %v872_v17 = vsub.f32 1.0, %v871_v16  ;;  %v868_v31 = vadd.f32 1.0, %v1195_v30 }
 0x7a3   :  { %1196 = vrcp.f32 %v867_v11  ;;  %v896_v46 = vand.u32 2147483648, %v867_v11  ;;  %vm890_vm12 = vweird.f32 %v867_v11  ;;  %v894_v50 = vand.u32 2147483647, %v867_v11 }
 0x7a4   :  { %v873_v19 = vmul.f32 %v1191_v15, %v872_v17  ;;  %1198 = vrcp.f32 %v868_v31  ;;  %v911_v57 = vand.u32 2147483648, %v868_v31  ;;  %vm905_vm2 = vweird.f32 %v868_v31 }
 0x7a5   :  { %v897_v53 = vor.u32 1.1754944e-38, %v896_v46  ;;  %1200 = vpow2.f32 %v1069_v48  ;;  %vm895_vm14 = vcmp.eq.f32.partialorder %v894_v50, 8.507059e+37  ;;  %v909_v47 = vand.u32 2147483647, %v868_v31 }
 0x7a6   :  { %v874_v20 = vadd.f32 %v1191_v15, %v873_v19  ;;  %v912_v43 = vor.u32 1.1754944e-38, %v911_v57 }
 0x7a7   :  { %vm910_vm5 = vcmp.eq.f32.partialorder %v909_v47, 8.507059e+37 }
 0x7a8   :  { %v878_v25 = vsel %vm877_vm9, %v1191_v15, %v874_v20 }
 0x7a9   :  { %v1542_v28 = vsel %vm880_vm10, %v882_v26, %v878_v25  ;;  %v1197_v32 = vpop.eup %1196 }
 0x7aa   :  { %v886_v34 = vmul.f32 %v1197_v32, %v867_v11  ;;  %v1199_v37 = vpop.eup %1198  ;;  %vm891_vm11 = vweird.f32 %v1197_v32  ;;  %v934_v12 = vmul.f32 %v1542_v28, %v1492_v33 }
 0x7ab   :  { %v901_v41 = vmul.f32 %v1199_v37, %v868_v31  ;;  %vm892_vm13 = vmor %vm890_vm12, %vm891_vm11  ;;  %vm906_vm15 = vweird.f32 %v1199_v37  ;;  %v1201_v51 = vpop.eup %1200 }
 0x7ac   :  { %v887_v36 = vsub.f32 1.0, %v886_v34  ;;  %vm907_vm3 = vmor %vm905_vm2, %vm906_vm15  ;;  %v869_v59 = vadd.f32 1.0, %v1201_v51 }
 0x7ad   :  { %v902_v45 = vsub.f32 1.0, %v901_v41 }
 0x7ae   :  { %v888_v40 = vmul.f32 %v1197_v32, %v887_v36  ;;  %1202 = vrcp.f32 %v869_v59  ;;  %v926_v4 = vand.u32 2147483648, %v869_v59  ;;  %vm920_vm7 = vweird.f32 %v869_v59 }
 0x7af   :  { %v903_v35 = vmul.f32 %v1199_v37, %v902_v45  ;;  %v924_v5 = vand.u32 2147483647, %v869_v59 }
 0x7b0   :  { %v889_v44 = vadd.f32 %v1197_v32, %v888_v40  ;;  %v927_v7 = vor.u32 1.1754944e-38, %v926_v4 }
 0x7b1   :  { %v904_v56 = vadd.f32 %v1199_v37, %v903_v35  ;;  %vm925_vm1 = vcmp.eq.f32.partialorder %v924_v5, 8.507059e+37 }
 0x7b2   :  { %v893_v55 = vsel %vm892_vm13, %v1197_v32, %v889_v44 }
 0x7b3   :  { %v1546_v52 = vsel %vm895_vm14, %v897_v53, %v893_v55  ;;  %v908_v58 = vsel %vm907_vm3, %v1199_v37, %v904_v56 }
 0x7b4   :  { %v913_v60 = vsel %vm910_vm5, %v912_v43, %v908_v58  ;;  %v1203_v63 = vpop.eup %1202  ;;  %v935_v15 = vmul.f32 %v1546_v52, %v1498_v38 }
 0x7b5   :  { %v916_v0 = vmul.f32 %v1203_v63, %v869_v59  ;;  %vm921_vm6 = vweird.f32 %v1203_v63  ;;  %v936_v20 = vmul.f32 %v913_v60, %v1502_v42 }
 0x7b6   :  { %vm922_vm0 = vmor %vm920_vm7, %vm921_vm6 }
 0x7b7   :  { %v917_v1 = vsub.f32 1.0, %v916_v0 }
 0x7b9   :  { %v918_v2 = vmul.f32 %v1203_v63, %v917_v1 }
 0x7bb   :  { %v919_v3 = vadd.f32 %v1203_v63, %v918_v2 }
 0x7bd   :  { %v923_v6 = vsel %vm922_vm0, %v1203_v63, %v919_v3 }
 0x7be   :  { %v928_v9 = vsel %vm925_vm1, %v927_v7, %v923_v6 }
 0x7bf   :  { %v937_v23 = vmul.f32 %v928_v9, %v1507_v49 }
 0x7c0   :  { %v943_v27 = vpop.permute.xlu0 %942 }
 0x7c1   :  { %v954_v29 = vmul.f32 %v943_v27, %v1542_v28 }
 0x7c3   :  { %962 = vrot.lane.b32.xlu1 %v954_v29, %s1214_s9 }
 0x7e0   :  { %v945_v39 = vpop.permute.xlu1 %944 }
 0x7e1   :  { %v955_v54 = vmul.f32 %v945_v39, %v1546_v52 }
 0x7e3   :  { %964 = vrot.lane.b32.xlu2 %v955_v54, %s1214_s9 }
 0x7e8   :  { %v947_v61 = vpop.permute.xlu2 %946 }
 0x7e9   :  { %v956_v62 = vmul.f32 %v947_v61, %v913_v60 }
 0x7eb   :  { %966 = vrot.lane.b32.xlu0 %v956_v62, %s1214_s9 }
 0x808   :  { %v949_v8 = vpop.permute.xlu0 %948 }
 0x809   :  { %v957_v10 = vmul.f32 %v949_v8, %v928_v9 }
 0x80b   :  { %968 = vrot.lane.b32.xlu1 %v957_v10, %s1214_s9 }
 0x835   :  { %v963_v13 = vpop.permute.xlu1 %962 }
 0x836   :  { %v974_v14 = vadd.f32 %v963_v13, %v934_v12 }
 0x838   :  { %1204 = vtanh.f32 %v974_v14 }
 0x83d   :  { %v965_v16 = vpop.permute.xlu2 %964 }
 0x83e   :  { %v1205_v17 = vpop.eup %1204  ;;  %v975_v18 = vadd.f32 %v965_v16, %v935_v15 }
 0x83f   :  { %986 = vrot.lane.b32.xlu2 %v1205_v17, %s1215_s10 }
 0x840   :  { %1206 = vtanh.f32 %v975_v18 }
 0x846   :  { %v1207_v19 = vpop.eup %1206 }
 0x847   :  { %988 = vrot.lane.b32.xlu0 %v1207_v19, %s1215_s10 }
 0x85d   :  { %v967_v21 = vpop.permute.xlu0 %966 }
 0x85e   :  { %v976_v22 = vadd.f32 %v967_v21, %v936_v20 }
 0x860   :  { %1208 = vtanh.f32 %v976_v22 }
 0x866   :  { %v1209_v33 = vpop.eup %1208 }
 0x867   :  { %990 = vrot.lane.b32.xlu1 %v1209_v33, %s1215_s10 }
 0x87d   :  { %v969_v38 = vpop.permute.xlu1 %968 }
 0x87e   :  { %v977_v24 = vadd.f32 %v969_v38, %v937_v23 }
 0x880   :  { %1210 = vtanh.f32 %v977_v24 }
 0x886   :  { %v1211_v25 = vpop.eup %1210 }
 0x887   :  { %992 = vrot.lane.b32.xlu2 %v1211_v25, %s1215_s10 }
 0x899   :  { %v987_v26 = vpop.permute.xlu2 %986 }
 0x89a   :  { %v998_v11 = vmul.f32 %v987_v26, %v1542_v28 }
 0x89c   :  { %1006 = vrot.lane.b32.xlu0 %v998_v11, %s1216_s11 }
 0x8b9   :  { %v989_v42 = vpop.permute.xlu0 %988 }
 0x8ba   :  { %v999_v27 = vmul.f32 %v989_v42, %v1546_v52 }
 0x8bc   :  { %1008 = vrot.lane.b32.xlu1 %v999_v27, %s1216_s11 }
 0x8d9   :  { %v991_v29 = vpop.permute.xlu1 %990 }
 0x8da   :  { %v1000_v30 = vmul.f32 %v991_v29, %v913_v60 }
 0x8dc   :  { %1010 = vrot.lane.b32.xlu2 %v1000_v30, %s1216_s11 }
 0x8e1   :  { %v993_v49 = vpop.permute.xlu2 %992 }
 0x8e2   :  { %v1001_v31 = vmul.f32 %v993_v49, %v928_v9 }
 0x8e4   :  { %1012 = vrot.lane.b32.xlu0 %v1001_v31, %s1216_s11 }
 0x90e   :  { %v1007_v32 = vpop.permute.xlu0 %1006 }
 0x90f   :  { %1018 = vst.msk [vmem:[%s1588_s4 + $0x60] sm:$0xff] %vm178_vm4, %v1007_v32 }
 0x92e   :  { %v1009_v28 = vpop.permute.xlu1 %1008 }
 0x92f   :  { %1019 = vst.msk [vmem:[%s1588_s4 + $0x68] sm:$0xff] %vm178_vm4, %v1009_v28 }
 0x936   :  { %v1011_v34 = vpop.permute.xlu2 %1010 }
 0x937   :  { %1020 = vst.msk [vmem:[%s1588_s4 + $0x70] sm:$0xff] %vm178_vm4, %v1011_v34 }
 0x956   :  { %v1013_v36 = vpop.permute.xlu0 %1012 }
 0x957   :  { %1021 = vst.msk [vmem:[%s1588_s4 + $0x78] sm:$0xff] %vm178_vm4, %v1013_v36 }

</bundles_post_ra>
